<compile_context>
chip_gen: v7x
topology: tpu7x:2x2x1
jax: 0.10.0
libtpu: 0.0.40
codegen_flags: <defaults>
</compile_context>

<pallas_src>
import functools

import numpy as np
import jax
import jax.numpy as jnp
from jax import lax
from jax.experimental import pallas as pl
from jax.experimental.pallas import tpu as pltpu


# ----------------------------------------------------------------------------------
# Pallas kernel: one grid step = one batch*group element.  Loops over all K
# displacements, `group` at a time, and writes one lane-dense (Ho, group*Wo) slab
# per inner iteration.
# ----------------------------------------------------------------------------------
def _corr_kernel(rs_ref, cs_ref, x1_ref, x2_ref, out_ref, *, Ho, Wo, group, n_groups):
    x1 = x1_ref[...]                                        # (Ho, Wo, Cg), resident

    def body(g, carry):
        base = g * group
        parts = []
        for j in range(group):                              # unrolled: static lane offsets
            rs = rs_ref[base + j]                           # phase-folded row start (SMEM)
            cs = cs_ref[base + j]                           # col start (SMEM)
            win = x2_ref[pl.ds(rs, Ho), pl.ds(cs, Wo), :]   # (Ho, Wo, Cg)
            parts.append(jnp.sum(x1 * win, axis=-1))        # (Ho, Wo)
        out_ref[g] = jnp.concatenate(parts, axis=-1)        # (Ho, group*Wo) dense store
        return carry

    lax.fori_loop(0, n_groups, body, 0)


def _dilated_cost_volume_level(x1, x2, dilations, stride, max_displacement=4, num_groups=1):
    """One MatryoshkaDilatedCostVolume (one encoder level). x1, x2 are NCHW float32."""
    B, C, H, W = x1.shape
    G = num_groups
    assert C % G == 0
    Cg = C // G
    S = int(stride)
    md = int(max_displacement)
    P = 2 * md + 1
    D = len(dilations)
    K = D * P * P
    R = md * max(dilations)                   # max absolute displacement in pixels
    Ho = (H - 1) // S + 1
    Wo = (W - 1) // S + 1
    # Modest, clamped padding: enough for any partially-overlapping window; fully
    # out-of-range windows are redirected (via start clamping) into the zero pad.
    rpad = min(-(-R // S), Ho)
    cpad = min(-(-R // S), Wo)
    Hq = Ho + 2 * rpad                        # per-phase padded extent (rows)
    Wq = Wo + 2 * cpad                        # per-phase padded extent (cols)

    # ---- glue: NCHW -> channels-last, strided sample of x1, phase split of x2 ----
    x1g = jnp.transpose(x1.reshape(B * G, Cg, H, W), (0, 2, 3, 1))   # (BG, H, W, Cg)
    x2g = jnp.transpose(x2.reshape(B * G, Cg, H, W), (0, 2, 3, 1))   # (BG, H, W, Cg)
    x1s = x1g[:, ::S, ::S, :]                                        # (BG, Ho, Wo, Cg)

    x2p = jnp.pad(x2g, ((0, 0), (0, S * Ho - H), (0, S * Wo - W), (0, 0)))
    phases = []
    for ry in range(S):
        for rx in range(S):
            phs = x2p[:, ry::S, rx::S, :]                            # (BG, Ho, Wo, Cg)
            phases.append(jnp.pad(phs, ((0, 0), (rpad, rpad), (cpad, cpad), (0, 0))))
    # fold phase index into the row axis so the kernel only needs a 3-D ref
    x2ph = jnp.concatenate(phases, axis=1)                           # (BG, S*S*Hq, Wq, Cg)

    # ---- displacement tables (scalar-prefetched into SMEM), K padded to `group` ----
    group = max(1, 128 // Wo)                 # displacements packed per output slab
    Kp = (-(-K // group)) * group
    KG = Kp // group
    rs_tab = np.zeros((Kp,), np.int32)
    cs_tab = np.zeros((Kp,), np.int32)
    idx = 0
    for d in dilations:
        for pi in range(P):
            for pj in range(P):
                dy = (pi - md) * d
                dx = (pj - md) * d
                ry, rx = dy % S, dx % S
                offy, offx = (dy - ry) // S, (dx - rx) // S
                qy = min(max(offy + rpad, 0), Hq - Ho)   # clamp -> zero-pad window
                qx = min(max(offx + cpad, 0), Wq - Wo)
                rs_tab[idx] = (ry * S + rx) * Hq + qy
                cs_tab[idx] = qx
                idx += 1
    rs_tab = jnp.asarray(rs_tab)
    cs_tab = jnp.asarray(cs_tab)

    grid_spec = pltpu.PrefetchScalarGridSpec(
        num_scalar_prefetch=2,
        grid=(B * G,),
        in_specs=[
            pl.BlockSpec((None, Ho, Wo, Cg),
                         lambda b, rs, cs: (b, 0, 0, 0)),
            pl.BlockSpec((None, S * S * Hq, Wq, Cg),
                         lambda b, rs, cs: (b, 0, 0, 0)),
        ],
        out_specs=pl.BlockSpec((None, KG, Ho, group * Wo),
                               lambda b, rs, cs: (b, 0, 0, 0)),
    )

    out = pl.pallas_call(
        functools.partial(_corr_kernel, Ho=Ho, Wo=Wo, group=group, n_groups=KG),
        out_shape=jax.ShapeDtypeStruct((B * G, KG, Ho, group * Wo), jnp.float32),
        grid_spec=grid_spec,
        compiler_params=pltpu.CompilerParams(
            dimension_semantics=("parallel",)),      # both TCs busy on v7x when B*G >= 2
    )(rs_tab, cs_tab, x1s, x2ph)

    # unpack the lane-packed displacements, drop the padded k's
    out = out.reshape(B * G, KG, Ho, group, Wo)
    out = jnp.transpose(out, (0, 1, 3, 2, 4)).reshape(B * G, Kp, Ho, Wo)[:, :K]
    # (BG, D*P*P, Ho, Wo) -> (B, D*G, P, P, Ho, Wo) with torch's (dilation-major, group) order
    out = out.reshape(B, G, D, P, P, Ho, Wo)
    out = jnp.transpose(out, (0, 2, 1, 3, 4, 5, 6)).reshape(B, D * G, P, P, Ho, Wo)
    return out


def _global_flow_offsets(dilations, encoder_output_strides, max_displacement=4):
    """Deterministic buffers from __init__ (offsets / offsets_2d); not used in forward."""
    rows = []
    for dil_list, fs in zip(dilations, encoder_output_strides):
        for d in dil_list:
            rows.append(np.arange(-max_displacement, max_displacement + 1) * d * fs)
    offs = np.asarray(rows, dtype=np.float32)                      # (num_dil, P)
    nd, P = offs.shape
    offsets_2d = np.zeros((nd, P, P, 2), dtype=np.float32)
    for i in range(nd):
        oi, oj = np.meshgrid(offs[i], offs[i], indexing="ij")
        offsets_2d[i, :, :, 0] = oi
        offsets_2d[i, :, :, 1] = oj
    return jnp.asarray(offs), jnp.asarray(offsets_2d)


def matryoshka_dilated_cost_volume_list(
        x1_list, x2_list, *, num_groups=1, max_displacement=4,
        encoder_output_strides=(2, 8), dilations=((1,), (1, 2, 3, 5, 9, 16)),
        normalize_feat_l2=False, use_relu=False):
    costs = []
    for x1, x2, dil, fs in zip(x1_list, x2_list, dilations, encoder_output_strides):
        assert fs <= 8
        if normalize_feat_l2:
            x1 = x1 / (jnp.sqrt(jnp.sum(x1 * x1, axis=1, keepdims=True)) + 1e-9)
            x2 = x2 / (jnp.sqrt(jnp.sum(x2 * x2, axis=1, keepdims=True)) + 1e-9)
        c = _dilated_cost_volume_level(
            x1, x2, list(dil), stride=8 // fs,
            max_displacement=max_displacement, num_groups=num_groups)
        if use_relu:
            c = jnp.where(c >= 0, c, 0.1 * c)   # F.leaky_relu(cost, 0.1), as in the module
        costs.append(c)
    return jnp.concatenate(costs, axis=1)


# ------------------------------- pure-JAX reference -------------------------------
def _reference_level(x1, x2, dilations, stride, max_displacement, num_groups):
    B, C, H, W = x1.shape
    G = num_groups
    Cg = C // G
    S, md = stride, max_displacement
    P = 2 * md + 1
    Ho = (H - 1) // S + 1
    Wo = (W - 1) // S + 1
    Rm = md * max(dilations)
    x1g = x1.reshape(B * G, Cg, H, W)
    x2g = x2.reshape(B * G, Cg, H, W)
    x2p = jnp.pad(x2g, ((0, 0), (0, 0), (Rm, Rm + S * Ho), (Rm, Rm + S * Wo)))
    x1s = x1g[:, :, ::S, ::S][:, :, :Ho, :Wo]
    per_dil = []
    for d in dilations:
        vols = []
        for pi in range(P):
            for pj in range(P):
                dy = (pi - md) * d
                dx = (pj - md) * d
                x2s = x2p[:, :, Rm + dy::S, Rm + dx::S][:, :, :Ho, :Wo]
                vols.append(jnp.sum(x1s * x2s, axis=1))
        v = jnp.stack(vols, axis=1).reshape(B, G, P, P, Ho, Wo)
        per_dil.append(v)
    return jnp.concatenate(per_dil, axis=1)


def _reference_list(x1_list, x2_list, **kw):
    dil = kw.get("dilations", ((1,), (1, 2, 3, 5, 9, 16)))
    strides = kw.get("encoder_output_strides", (2, 8))
    out = []
    for x1, x2, d, fs in zip(x1_list, x2_list, dil, strides):
        out.append(_reference_level(x1, x2, list(d), 8 // fs,
                                    kw.get("max_displacement", 4),
                                    kw.get("num_groups", 1)))
    return jnp.concatenate(out, axis=1)


if __name__ == "__main__":
    key = jax.random.PRNGKey(0)
    k1, k2, k3, k4 = jax.random.split(key, 4)

    B, C = 2, 16
    # encoder stride-2 features (subsampled by 4 inside the cost volume)
    x1_s2 = jax.random.normal(k1, (B, C, 32, 32), jnp.float32)
    x2_s2 = jax.random.normal(k2, (B, C, 32, 32), jnp.float32)
    # encoder stride-8 features
    x1_s8 = jax.random.normal(k3, (B, C, 8, 8), jnp.float32)
    x2_s8 = jax.random.normal(k4, (B, C, 8, 8), jnp.float32)

    # deterministic "__init__" buffers (not used in forward, kept for parity)
    _offsets, _offsets_2d = _global_flow_offsets(
        dilations=((1,), (1, 2, 3, 5, 9, 16)), encoder_output_strides=(2, 8))

    out = matryoshka_dilated_cost_volume_list([x1_s2, x1_s8], [x2_s2, x2_s8])
    out = jax.block_until_ready(out)
    assert out.shape == (B, 7, 9, 9, 8, 8), out.shape

    ref = jax.block_until_ready(_reference_list([x1_s2, x1_s8], [x2_s2, x2_s8]))
    np.testing.assert_allclose(np.asarray(out), np.asarray(ref), rtol=1e-4, atol=1e-4)

    print("KERNEL_OK")
</pallas_src>

<mosaic_0001>
module attributes {stable_mosaic.version = 11 : i64} {
  func.func @_corr_kernel(%arg0: i32, %arg1: memref<96xi32, #tpu.memory_space<smem>>, %arg2: memref<96xi32, #tpu.memory_space<smem>>, %arg3: memref<1x8x8x16xf32, #tpu.memory_space<vmem>>, %arg4: memref<1x160x10x16xf32, #tpu.memory_space<vmem>>, %arg5: memref<1x6x8x128xf32, #tpu.memory_space<vmem>>) attributes {dimension_semantics = [#tpu.dimension_semantics<parallel>], iteration_bounds = array<i64: 2>, scalar_prefetch = 2 : i64, scratch_operands = 0 : i64, tpu.core_type = #tpu.core_type<tc>, window_params = [{transform_indices = @transform_0, window_bounds = array<i64: 1, 8, 8, 16>}, {transform_indices = @transform_1, window_bounds = array<i64: 1, 160, 10, 16>}, {transform_indices = @transform_2, window_bounds = array<i64: 1, 6, 8, 128>}]} {
    %c0 = arith.constant 0 : index
    %c0_0 = arith.constant 0 : index
    %c0_1 = arith.constant 0 : index
    %c0_2 = arith.constant 0 : index
    %0 = vector.load %arg3[%c0, %c0_0, %c0_1, %c0_2] : memref<1x8x8x16xf32, #tpu.memory_space<vmem>>, vector<1x8x8x16xf32>
    %1 = vector.shape_cast %0 : vector<1x8x8x16xf32> to vector<8x8x16xf32>
    %c0_i32 = arith.constant 0 : i32
    %c6_i32 = arith.constant 6 : i32
    %2 = arith.addi %c0_i32, %c6_i32 : i32
    %c1_i32 = arith.constant 1 : i32
    scf.for %arg6 = %c0_i32 to %2 step %c1_i32  : i32 {
      %c16_i32 = arith.constant 16 : i32
      %3 = arith.muli %arg6, %c16_i32 : i32
      %c0_i32_4 = arith.constant 0 : i32
      %4 = arith.addi %3, %c0_i32_4 : i32
      %5 = arith.index_cast %4 : i32 to index
      %6 = memref.load %arg1[%5] : memref<96xi32, #tpu.memory_space<smem>>
      %c0_i32_5 = arith.constant 0 : i32
      %7 = arith.addi %3, %c0_i32_5 : i32
      %8 = arith.index_cast %7 : i32 to index
      %9 = memref.load %arg2[%8] : memref<96xi32, #tpu.memory_space<smem>>
      %c0_6 = arith.constant 0 : index
      %10 = arith.index_cast %6 : i32 to index
      %11 = arith.index_cast %9 : i32 to index
      %c0_7 = arith.constant 0 : index
      %12 = vector.load %arg4[%c0_6, %10, %11, %c0_7] : memref<1x160x10x16xf32, #tpu.memory_space<vmem>>, vector<1x8x8x16xf32>
      %13 = vector.shape_cast %12 : vector<1x8x8x16xf32> to vector<8x8x16xf32>
      %14 = arith.mulf %1, %13 : vector<8x8x16xf32>
      %cst = arith.constant dense<0.000000e+00> : vector<8x8xf32>
      %15 = vector.multi_reduction <add>, %14, %cst [2] : vector<8x8x16xf32> to vector<8x8xf32>
      %c1_i32_8 = arith.constant 1 : i32
      %16 = arith.addi %3, %c1_i32_8 : i32
      %17 = arith.index_cast %16 : i32 to index
      %18 = memref.load %arg1[%17] : memref<96xi32, #tpu.memory_space<smem>>
      %c1_i32_9 = arith.constant 1 : i32
      %19 = arith.addi %3, %c1_i32_9 : i32
      %20 = arith.index_cast %19 : i32 to index
      %21 = memref.load %arg2[%20] : memref<96xi32, #tpu.memory_space<smem>>
      %c0_10 = arith.constant 0 : index
      %22 = arith.index_cast %18 : i32 to index
      %23 = arith.index_cast %21 : i32 to index
      %c0_11 = arith.constant 0 : index
      %24 = vector.load %arg4[%c0_10, %22, %23, %c0_11] : memref<1x160x10x16xf32, #tpu.memory_space<vmem>>, vector<1x8x8x16xf32>
      %25 = vector.shape_cast %24 : vector<1x8x8x16xf32> to vector<8x8x16xf32>
      %26 = arith.mulf %1, %25 : vector<8x8x16xf32>
      %cst_12 = arith.constant dense<0.000000e+00> : vector<8x8xf32>
      %27 = vector.multi_reduction <add>, %26, %cst_12 [2] : vector<8x8x16xf32> to vector<8x8xf32>
      %c2_i32 = arith.constant 2 : i32
      %28 = arith.addi %3, %c2_i32 : i32
      %29 = arith.index_cast %28 : i32 to index
      %30 = memref.load %arg1[%29] : memref<96xi32, #tpu.memory_space<smem>>
      %c2_i32_13 = arith.constant 2 : i32
      %31 = arith.addi %3, %c2_i32_13 : i32
      %32 = arith.index_cast %31 : i32 to index
      %33 = memref.load %arg2[%32] : memref<96xi32, #tpu.memory_space<smem>>
      %c0_14 = arith.constant 0 : index
      %34 = arith.index_cast %30 : i32 to index
      %35 = arith.index_cast %33 : i32 to index
      %c0_15 = arith.constant 0 : index
      %36 = vector.load %arg4[%c0_14, %34, %35, %c0_15] : memref<1x160x10x16xf32, #tpu.memory_space<vmem>>, vector<1x8x8x16xf32>
      %37 = vector.shape_cast %36 : vector<1x8x8x16xf32> to vector<8x8x16xf32>
      %38 = arith.mulf %1, %37 : vector<8x8x16xf32>
      %cst_16 = arith.constant dense<0.000000e+00> : vector<8x8xf32>
      %39 = vector.multi_reduction <add>, %38, %cst_16 [2] : vector<8x8x16xf32> to vector<8x8xf32>
      %c3_i32 = arith.constant 3 : i32
      %40 = arith.addi %3, %c3_i32 : i32
      %41 = arith.index_cast %40 : i32 to index
      %42 = memref.load %arg1[%41] : memref<96xi32, #tpu.memory_space<smem>>
      %c3_i32_17 = arith.constant 3 : i32
      %43 = arith.addi %3, %c3_i32_17 : i32
      %44 = arith.index_cast %43 : i32 to index
      %45 = memref.load %arg2[%44] : memref<96xi32, #tpu.memory_space<smem>>
      %c0_18 = arith.constant 0 : index
      %46 = arith.index_cast %42 : i32 to index
      %47 = arith.index_cast %45 : i32 to index
      %c0_19 = arith.constant 0 : index
      %48 = vector.load %arg4[%c0_18, %46, %47, %c0_19] : memref<1x160x10x16xf32, #tpu.memory_space<vmem>>, vector<1x8x8x16xf32>
      %49 = vector.shape_cast %48 : vector<1x8x8x16xf32> to vector<8x8x16xf32>
      %50 = arith.mulf %1, %49 : vector<8x8x16xf32>
      %cst_20 = arith.constant dense<0.000000e+00> : vector<8x8xf32>
      %51 = vector.multi_reduction <add>, %50, %cst_20 [2] : vector<8x8x16xf32> to vector<8x8xf32>
      %c4_i32 = arith.constant 4 : i32
      %52 = arith.addi %3, %c4_i32 : i32
      %53 = arith.index_cast %52 : i32 to index
      %54 = memref.load %arg1[%53] : memref<96xi32, #tpu.memory_space<smem>>
      %c4_i32_21 = arith.constant 4 : i32
      %55 = arith.addi %3, %c4_i32_21 : i32
      %56 = arith.index_cast %55 : i32 to index
      %57 = memref.load %arg2[%56] : memref<96xi32, #tpu.memory_space<smem>>
      %c0_22 = arith.constant 0 : index
      %58 = arith.index_cast %54 : i32 to index
      %59 = arith.index_cast %57 : i32 to index
      %c0_23 = arith.constant 0 : index
      %60 = vector.load %arg4[%c0_22, %58, %59, %c0_23] : memref<1x160x10x16xf32, #tpu.memory_space<vmem>>, vector<1x8x8x16xf32>
      %61 = vector.shape_cast %60 : vector<1x8x8x16xf32> to vector<8x8x16xf32>
      %62 = arith.mulf %1, %61 : vector<8x8x16xf32>
      %cst_24 = arith.constant dense<0.000000e+00> : vector<8x8xf32>
      %63 = vector.multi_reduction <add>, %62, %cst_24 [2] : vector<8x8x16xf32> to vector<8x8xf32>
      %c5_i32 = arith.constant 5 : i32
      %64 = arith.addi %3, %c5_i32 : i32
      %65 = arith.index_cast %64 : i32 to index
      %66 = memref.load %arg1[%65] : memref<96xi32, #tpu.memory_space<smem>>
      %c5_i32_25 = arith.constant 5 : i32
      %67 = arith.addi %3, %c5_i32_25 : i32
      %68 = arith.index_cast %67 : i32 to index
      %69 = memref.load %arg2[%68] : memref<96xi32, #tpu.memory_space<smem>>
      %c0_26 = arith.constant 0 : index
      %70 = arith.index_cast %66 : i32 to index
      %71 = arith.index_cast %69 : i32 to index
      %c0_27 = arith.constant 0 : index
      %72 = vector.load %arg4[%c0_26, %70, %71, %c0_27] : memref<1x160x10x16xf32, #tpu.memory_space<vmem>>, vector<1x8x8x16xf32>
      %73 = vector.shape_cast %72 : vector<1x8x8x16xf32> to vector<8x8x16xf32>
      %74 = arith.mulf %1, %73 : vector<8x8x16xf32>
      %cst_28 = arith.constant dense<0.000000e+00> : vector<8x8xf32>
      %75 = vector.multi_reduction <add>, %74, %cst_28 [2] : vector<8x8x16xf32> to vector<8x8xf32>
      %c6_i32_29 = arith.constant 6 : i32
      %76 = arith.addi %3, %c6_i32_29 : i32
      %77 = arith.index_cast %76 : i32 to index
      %78 = memref.load %arg1[%77] : memref<96xi32, #tpu.memory_space<smem>>
      %c6_i32_30 = arith.constant 6 : i32
      %79 = arith.addi %3, %c6_i32_30 : i32
      %80 = arith.index_cast %79 : i32 to index
      %81 = memref.load %arg2[%80] : memref<96xi32, #tpu.memory_space<smem>>
      %c0_31 = arith.constant 0 : index
      %82 = arith.index_cast %78 : i32 to index
      %83 = arith.index_cast %81 : i32 to index
      %c0_32 = arith.constant 0 : index
      %84 = vector.load %arg4[%c0_31, %82, %83, %c0_32] : memref<1x160x10x16xf32, #tpu.memory_space<vmem>>, vector<1x8x8x16xf32>
      %85 = vector.shape_cast %84 : vector<1x8x8x16xf32> to vector<8x8x16xf32>
      %86 = arith.mulf %1, %85 : vector<8x8x16xf32>
      %cst_33 = arith.constant dense<0.000000e+00> : vector<8x8xf32>
      %87 = vector.multi_reduction <add>, %86, %cst_33 [2] : vector<8x8x16xf32> to vector<8x8xf32>
      %c7_i32 = arith.constant 7 : i32
      %88 = arith.addi %3, %c7_i32 : i32
      %89 = arith.index_cast %88 : i32 to index
      %90 = memref.load %arg1[%89] : memref<96xi32, #tpu.memory_space<smem>>
      %c7_i32_34 = arith.constant 7 : i32
      %91 = arith.addi %3, %c7_i32_34 : i32
      %92 = arith.index_cast %91 : i32 to index
      %93 = memref.load %arg2[%92] : memref<96xi32, #tpu.memory_space<smem>>
      %c0_35 = arith.constant 0 : index
      %94 = arith.index_cast %90 : i32 to index
      %95 = arith.index_cast %93 : i32 to index
      %c0_36 = arith.constant 0 : index
      %96 = vector.load %arg4[%c0_35, %94, %95, %c0_36] : memref<1x160x10x16xf32, #tpu.memory_space<vmem>>, vector<1x8x8x16xf32>
      %97 = vector.shape_cast %96 : vector<1x8x8x16xf32> to vector<8x8x16xf32>
      %98 = arith.mulf %1, %97 : vector<8x8x16xf32>
      %cst_37 = arith.constant dense<0.000000e+00> : vector<8x8xf32>
      %99 = vector.multi_reduction <add>, %98, %cst_37 [2] : vector<8x8x16xf32> to vector<8x8xf32>
      %c8_i32 = arith.constant 8 : i32
      %100 = arith.addi %3, %c8_i32 : i32
      %101 = arith.index_cast %100 : i32 to index
      %102 = memref.load %arg1[%101] : memref<96xi32, #tpu.memory_space<smem>>
      %c8_i32_38 = arith.constant 8 : i32
      %103 = arith.addi %3, %c8_i32_38 : i32
      %104 = arith.index_cast %103 : i32 to index
      %105 = memref.load %arg2[%104] : memref<96xi32, #tpu.memory_space<smem>>
      %c0_39 = arith.constant 0 : index
      %106 = arith.index_cast %102 : i32 to index
      %107 = arith.index_cast %105 : i32 to index
      %c0_40 = arith.constant 0 : index
      %108 = vector.load %arg4[%c0_39, %106, %107, %c0_40] : memref<1x160x10x16xf32, #tpu.memory_space<vmem>>, vector<1x8x8x16xf32>
      %109 = vector.shape_cast %108 : vector<1x8x8x16xf32> to vector<8x8x16xf32>
      %110 = arith.mulf %1, %109 : vector<8x8x16xf32>
      %cst_41 = arith.constant dense<0.000000e+00> : vector<8x8xf32>
      %111 = vector.multi_reduction <add>, %110, %cst_41 [2] : vector<8x8x16xf32> to vector<8x8xf32>
      %c9_i32 = arith.constant 9 : i32
      %112 = arith.addi %3, %c9_i32 : i32
      %113 = arith.index_cast %112 : i32 to index
      %114 = memref.load %arg1[%113] : memref<96xi32, #tpu.memory_space<smem>>
      %c9_i32_42 = arith.constant 9 : i32
      %115 = arith.addi %3, %c9_i32_42 : i32
      %116 = arith.index_cast %115 : i32 to index
      %117 = memref.load %arg2[%116] : memref<96xi32, #tpu.memory_space<smem>>
      %c0_43 = arith.constant 0 : index
      %118 = arith.index_cast %114 : i32 to index
      %119 = arith.index_cast %117 : i32 to index
      %c0_44 = arith.constant 0 : index
      %120 = vector.load %arg4[%c0_43, %118, %119, %c0_44] : memref<1x160x10x16xf32, #tpu.memory_space<vmem>>, vector<1x8x8x16xf32>
      %121 = vector.shape_cast %120 : vector<1x8x8x16xf32> to vector<8x8x16xf32>
      %122 = arith.mulf %1, %121 : vector<8x8x16xf32>
      %cst_45 = arith.constant dense<0.000000e+00> : vector<8x8xf32>
      %123 = vector.multi_reduction <add>, %122, %cst_45 [2] : vector<8x8x16xf32> to vector<8x8xf32>
      %c10_i32 = arith.constant 10 : i32
      %124 = arith.addi %3, %c10_i32 : i32
      %125 = arith.index_cast %124 : i32 to index
      %126 = memref.load %arg1[%125] : memref<96xi32, #tpu.memory_space<smem>>
      %c10_i32_46 = arith.constant 10 : i32
      %127 = arith.addi %3, %c10_i32_46 : i32
      %128 = arith.index_cast %127 : i32 to index
      %129 = memref.load %arg2[%128] : memref<96xi32, #tpu.memory_space<smem>>
      %c0_47 = arith.constant 0 : index
      %130 = arith.index_cast %126 : i32 to index
      %131 = arith.index_cast %129 : i32 to index
      %c0_48 = arith.constant 0 : index
      %132 = vector.load %arg4[%c0_47, %130, %131, %c0_48] : memref<1x160x10x16xf32, #tpu.memory_space<vmem>>, vector<1x8x8x16xf32>
      %133 = vector.shape_cast %132 : vector<1x8x8x16xf32> to vector<8x8x16xf32>
      %134 = arith.mulf %1, %133 : vector<8x8x16xf32>
      %cst_49 = arith.constant dense<0.000000e+00> : vector<8x8xf32>
      %135 = vector.multi_reduction <add>, %134, %cst_49 [2] : vector<8x8x16xf32> to vector<8x8xf32>
      %c11_i32 = arith.constant 11 : i32
      %136 = arith.addi %3, %c11_i32 : i32
      %137 = arith.index_cast %136 : i32 to index
      %138 = memref.load %arg1[%137] : memref<96xi32, #tpu.memory_space<smem>>
      %c11_i32_50 = arith.constant 11 : i32
      %139 = arith.addi %3, %c11_i32_50 : i32
      %140 = arith.index_cast %139 : i32 to index
      %141 = memref.load %arg2[%140] : memref<96xi32, #tpu.memory_space<smem>>
      %c0_51 = arith.constant 0 : index
      %142 = arith.index_cast %138 : i32 to index
      %143 = arith.index_cast %141 : i32 to index
      %c0_52 = arith.constant 0 : index
      %144 = vector.load %arg4[%c0_51, %142, %143, %c0_52] : memref<1x160x10x16xf32, #tpu.memory_space<vmem>>, vector<1x8x8x16xf32>
      %145 = vector.shape_cast %144 : vector<1x8x8x16xf32> to vector<8x8x16xf32>
      %146 = arith.mulf %1, %145 : vector<8x8x16xf32>
      %cst_53 = arith.constant dense<0.000000e+00> : vector<8x8xf32>
      %147 = vector.multi_reduction <add>, %146, %cst_53 [2] : vector<8x8x16xf32> to vector<8x8xf32>
      %c12_i32 = arith.constant 12 : i32
      %148 = arith.addi %3, %c12_i32 : i32
      %149 = arith.index_cast %148 : i32 to index
      %150 = memref.load %arg1[%149] : memref<96xi32, #tpu.memory_space<smem>>
      %c12_i32_54 = arith.constant 12 : i32
      %151 = arith.addi %3, %c12_i32_54 : i32
      %152 = arith.index_cast %151 : i32 to index
      %153 = memref.load %arg2[%152] : memref<96xi32, #tpu.memory_space<smem>>
      %c0_55 = arith.constant 0 : index
      %154 = arith.index_cast %150 : i32 to index
      %155 = arith.index_cast %153 : i32 to index
      %c0_56 = arith.constant 0 : index
      %156 = vector.load %arg4[%c0_55, %154, %155, %c0_56] : memref<1x160x10x16xf32, #tpu.memory_space<vmem>>, vector<1x8x8x16xf32>
      %157 = vector.shape_cast %156 : vector<1x8x8x16xf32> to vector<8x8x16xf32>
      %158 = arith.mulf %1, %157 : vector<8x8x16xf32>
      %cst_57 = arith.constant dense<0.000000e+00> : vector<8x8xf32>
      %159 = vector.multi_reduction <add>, %158, %cst_57 [2] : vector<8x8x16xf32> to vector<8x8xf32>
      %c13_i32 = arith.constant 13 : i32
      %160 = arith.addi %3, %c13_i32 : i32
      %161 = arith.index_cast %160 : i32 to index
      %162 = memref.load %arg1[%161] : memref<96xi32, #tpu.memory_space<smem>>
      %c13_i32_58 = arith.constant 13 : i32
      %163 = arith.addi %3, %c13_i32_58 : i32
      %164 = arith.index_cast %163 : i32 to index
      %165 = memref.load %arg2[%164] : memref<96xi32, #tpu.memory_space<smem>>
      %c0_59 = arith.constant 0 : index
      %166 = arith.index_cast %162 : i32 to index
      %167 = arith.index_cast %165 : i32 to index
      %c0_60 = arith.constant 0 : index
      %168 = vector.load %arg4[%c0_59, %166, %167, %c0_60] : memref<1x160x10x16xf32, #tpu.memory_space<vmem>>, vector<1x8x8x16xf32>
      %169 = vector.shape_cast %168 : vector<1x8x8x16xf32> to vector<8x8x16xf32>
      %170 = arith.mulf %1, %169 : vector<8x8x16xf32>
      %cst_61 = arith.constant dense<0.000000e+00> : vector<8x8xf32>
      %171 = vector.multi_reduction <add>, %170, %cst_61 [2] : vector<8x8x16xf32> to vector<8x8xf32>
      %c14_i32 = arith.constant 14 : i32
      %172 = arith.addi %3, %c14_i32 : i32
      %173 = arith.index_cast %172 : i32 to index
      %174 = memref.load %arg1[%173] : memref<96xi32, #tpu.memory_space<smem>>
      %c14_i32_62 = arith.constant 14 : i32
      %175 = arith.addi %3, %c14_i32_62 : i32
      %176 = arith.index_cast %175 : i32 to index
      %177 = memref.load %arg2[%176] : memref<96xi32, #tpu.memory_space<smem>>
      %c0_63 = arith.constant 0 : index
      %178 = arith.index_cast %174 : i32 to index
      %179 = arith.index_cast %177 : i32 to index
      %c0_64 = arith.constant 0 : index
      %180 = vector.load %arg4[%c0_63, %178, %179, %c0_64] : memref<1x160x10x16xf32, #tpu.memory_space<vmem>>, vector<1x8x8x16xf32>
      %181 = vector.shape_cast %180 : vector<1x8x8x16xf32> to vector<8x8x16xf32>
      %182 = arith.mulf %1, %181 : vector<8x8x16xf32>
      %cst_65 = arith.constant dense<0.000000e+00> : vector<8x8xf32>
      %183 = vector.multi_reduction <add>, %182, %cst_65 [2] : vector<8x8x16xf32> to vector<8x8xf32>
      %c15_i32 = arith.constant 15 : i32
      %184 = arith.addi %3, %c15_i32 : i32
      %185 = arith.index_cast %184 : i32 to index
      %186 = memref.load %arg1[%185] : memref<96xi32, #tpu.memory_space<smem>>
      %c15_i32_66 = arith.constant 15 : i32
      %187 = arith.addi %3, %c15_i32_66 : i32
      %188 = arith.index_cast %187 : i32 to index
      %189 = memref.load %arg2[%188] : memref<96xi32, #tpu.memory_space<smem>>
      %c0_67 = arith.constant 0 : index
      %190 = arith.index_cast %186 : i32 to index
      %191 = arith.index_cast %189 : i32 to index
      %c0_68 = arith.constant 0 : index
      %192 = vector.load %arg4[%c0_67, %190, %191, %c0_68] : memref<1x160x10x16xf32, #tpu.memory_space<vmem>>, vector<1x8x8x16xf32>
      %193 = vector.shape_cast %192 : vector<1x8x8x16xf32> to vector<8x8x16xf32>
      %194 = arith.mulf %1, %193 : vector<8x8x16xf32>
      %cst_69 = arith.constant dense<0.000000e+00> : vector<8x8xf32>
      %195 = vector.multi_reduction <add>, %194, %cst_69 [2] : vector<8x8x16xf32> to vector<8x8xf32>
      %196 = tpu.concatenate %15, %27, %39, %51, %63, %75, %87, %99, %111, %123, %135, %147, %159, %171, %183, %195 in 1 : vector<8x8xf32>, vector<8x8xf32>, vector<8x8xf32>, vector<8x8xf32>, vector<8x8xf32>, vector<8x8xf32>, vector<8x8xf32>, vector<8x8xf32>, vector<8x8xf32>, vector<8x8xf32>, vector<8x8xf32>, vector<8x8xf32>, vector<8x8xf32>, vector<8x8xf32>, vector<8x8xf32>, vector<8x8xf32> -> vector<8x128xf32>
      %c0_70 = arith.constant 0 : index
      %197 = arith.index_cast %arg6 : i32 to index
      %c0_71 = arith.constant 0 : index
      %c0_72 = arith.constant 0 : index
      %198 = vector.load %arg5[%c0_70, %197, %c0_71, %c0_72] : memref<1x6x8x128xf32, #tpu.memory_space<vmem>>, vector<1x1x8x128xf32>
      %199 = vector.shape_cast %198 : vector<1x1x8x128xf32> to vector<8x128xf32>
      %200 = vector.shape_cast %196 : vector<8x128xf32> to vector<1x1x8x128xf32>
      tpu.vector_store %arg5[%c0_70, %197, %c0_71, %c0_72], %200 {strides = array<i32>} : memref<1x6x8x128xf32, #tpu.memory_space<vmem>>, vector<1x1x8x128xf32>,
    }
    %c6_i32_3 = arith.constant 6 : i32
    return
  }
  func.func @transform_0(%arg0: i32, %arg1: memref<96xi32, #tpu.memory_space<smem>>, %arg2: memref<96xi32, #tpu.memory_space<smem>>) -> (i32, i32, i32, i32) {
    %c0_i32 = arith.constant 0 : i32
    %c0_i32_0 = arith.constant 0 : i32
    %c0_i32_1 = arith.constant 0 : i32
    %c0_i32_2 = arith.constant 0 : i32
    return %arg0, %c0_i32, %c0_i32_0, %c0_i32_1 : i32, i32, i32, i32
  }
  func.func @transform_1(%arg0: i32, %arg1: memref<96xi32, #tpu.memory_space<smem>>, %arg2: memref<96xi32, #tpu.memory_space<smem>>) -> (i32, i32, i32, i32) {
    %c0_i32 = arith.constant 0 : i32
    %c0_i32_0 = arith.constant 0 : i32
    %c0_i32_1 = arith.constant 0 : i32
    %c0_i32_2 = arith.constant 0 : i32
    return %arg0, %c0_i32, %c0_i32_0, %c0_i32_1 : i32, i32, i32, i32
  }
  func.func @transform_2(%arg0: i32, %arg1: memref<96xi32, #tpu.memory_space<smem>>, %arg2: memref<96xi32, #tpu.memory_space<smem>>) -> (i32, i32, i32, i32) {
    %c0_i32 = arith.constant 0 : i32
    %c0_i32_0 = arith.constant 0 : i32
    %c0_i32_1 = arith.constant 0 : i32
    %c0_i32_2 = arith.constant 0 : i32
    return %arg0, %c0_i32, %c0_i32_0, %c0_i32_1 : i32, i32, i32, i32
  }
}

</mosaic_0001>

<bundles_post_ra>
// kernel: tpu_custom_call.1
= control target key start
LH: loop header
LB: loop body
LE: loop exit
PB: predicated region body
PF: predicated region fallthrough
CT: control target
= control target key end

     0   :  { %s3016_s0 = inlined_call_operand.vmem [shape: s32[96], index: 0, kind: input, shape index: {}]   ;;  %s3017_s2 = inlined_call_operand.vmem [shape: f32[2,8,8,16], index: 2, kind: input, shape index: {}]   ;;  %s3018_s3 = inlined_call_operand.vmem [shape: f32[2,160,10,16], index: 3, kind: input, shape index: {}]   ;;  %s3019_s4 = inlined_call_operand.hbm [shape: f32[2,6,8,128], index: 4, kind: output, shape index: {}]   ;;  %s3020_s1 = inlined_call_operand.vmem [shape: s32[96], index: 1, kind: input, shape index: {}]  }
   0x1   :  { %s9_s17 = sshll.u32 %s3016_s0, 4  ;;  %s13_s20 = sshll.u32 %s3020_s1, 4  ;;  %s10_s17 = int_to_ptr.vmem [resolvable:$true] %s9_s17  ;;  %s14_s20 = int_to_ptr.vmem [resolvable:$true] %s13_s20 }
   0x2   :  { %s1975_s21 = scalar_lea.vmem %s10_s17, 16  ;;  %p1980_p1 = scmp.lt.s32.totalorder %s10_s17, %s10_s17 }
   0x3   :  { %p1976_p0 = scmp.ne.s32.totalorder %s10_s17, %s1975_s21  ;;  %p1981_p2 = scmp.lt.s32.totalorder %s1975_s21, %s1975_s21 }
   0x5   :  { %p1982_p3 = por %p1981_p2, %p1980_p1 }
   0x7   :  { %p1983_p4 = pnand %p1982_p3, %p1976_p0 }
   0x9   :  { %1986 = shalt.err (!%p1983_p4)  }
   0xa   :  { %s2073_s22 = smov [#allocation3]   ;;  %s1987_s23 = scalar_lea.vmem %s14_s20, 16 }
   0xb   :  { %12 = dma.vmem_to_smem %s10_s17, 16, %s2073_s22, [#allocation2] }
   0xc   :  { %p1988_p5 = scmp.ne.s32.totalorder %s14_s20, %s1987_s23  ;;  %p1992_p6 = scmp.lt.s32.totalorder %s14_s20, %s14_s20 }
   0xd   :  { %p1993_p7 = scmp.lt.s32.totalorder %s1987_s23, %s1987_s23 }
   0xf   :  { %p1994_p8 = por %p1993_p7, %p1992_p6 }
  0x11   :  { %p1995_p9 = pnand %p1994_p8, %p1988_p5 }
  0x13   :  { %1998 = shalt.err (!%p1995_p9)  }
  0x14   :  { %s2074_s0 = smov [#allocation4]  }
  0x15   :  { %16 = dma.vmem_to_smem %s14_s20, 16, %s2074_s0, [#allocation2] }
  0x16   :  { %2047 = dma.done.wait [#allocation2], 32 }
  0x17   :  { %2048 = vsyncadd [#allocation2], 4294967264 }
  0x18   :  { %18 = sfence }
  0x19   :  { %19 = vsyncpa [#allocation6], 0 }
  0x1a   :  { %21 = vsyncpa [#allocation6 + $0x1], 0  ;;  %s2109_s1 = smov 0   ;;  %s2111_s24 = smov 0  }
  0x1b   :  { %s2113_s25 = smov 0   ;;  %s2115_s26 = smov 0  }
  0x1c LB: > { %s2130_s27 = sadd.s32 4294967295, %s2067_s26   ;;  %s1892_s28 = sadd.s32 4294967294, %s2067_s26   ;;  %s2067_s26 = sphi %s2115_s26, %s3026_s26   ;;  %s2063_s25 = sphi %s2113_s25, %s3025_s25   ;;  %s2059_s24 = sphi %s2111_s24, %s3024_s24   ;;  %s2055_s1 = sphi %s2109_s1, %s3023_s1  }
  0x1d   : > { %s2134_s29 = sadd.s32 1, %s2067_s26   ;;  %s86_s30 = sadd.s32 1, %s2063_s25 }
  0x1e   : > { %s83_s5 = ssub.s32 %s2067_s26, %s2134_s29  ;;  %p96_p10 = scmp.ne.s32.totalorder %s2063_s25, %s2059_s24 }
  0x1f   : > { %p84_p11 = scmp.eq.s32.totalorder %s83_s5, 0  ;;  %p97_p12 = scmp.eq.s32.totalorder %s2130_s27, 1 }
  0x20   : > { %p102_p13 = scmp.ne.s32.totalorder %s2059_s24, %s2055_s1  ;;  %p103_p0 = scmp.eq.s32.totalorder %s1892_s28, 1 }
  0x21   : > { %s2145_s6 = scalar_select %p84_p11, %s2063_s25, %s86_s30  }
  0x22   : > { %p2147_p1 = por %p97_p12, %p96_p10  ;;  %p2151_p2 = por %p103_p0, %p102_p13 }
  0x23   : > { %p1895_p3 = scmp.ge.s32.totalorder %s2067_s26, 1  ;;  %p137_p4 = scmp.lt.s32.totalorder %s2067_s26, 3 }
  0x25   : > { %p138_p5 = pnand %p1895_p3, %p137_p4 }
  0x26   : > { %s161_s9 = sand.u32 (!%p138_p5), 1, %s2059_s24   ;;  %p164_p6 = scmp.lt.s32.totalorder (!%p138_p5), %s2130_s27, 1 }
  0x27   : > { %141 = sbr.rel (%p138_p5) target bundleno = 482 (0x1e2), region = 28  ;;  %s2189_s21 = smov (!%p138_p5), 0  }
  0x28   : > { %s2161_s10 = smul.u32 (!%p138_p5), 48, %s161_s9 }
  0x2a   : > { %s163_s20 = scalar_lea.vmem (!%p138_p5), [#allocation5], %s2161_s10 }
  0x2e   : > { %s165_s11 = scalar_select %p164_p6, %s2130_s27, 1 }
  0x30   : > { %s1920_s12 = sshll.u32 %s165_s11, 6  ;;  %s1922_s13 = smul.u32 2560, %s165_s11 }
  0x31   : > { %s168_s16 = scalar_lea.vmem %s3017_s2, %s1920_s12 }
  0x32   : > { %s2170_s19 = scalar_lea.vmem %s3018_s3, %s1922_s13  ;;  %v2172_v0 = vld [vmem:[%s168_s16] sm:$0xff]  ;;  %v2174_v1 = vld [vmem:[%s168_s16 + $0x8] sm:$0xff]  ;;  %v2176_v2 = vld [vmem:[%s168_s16 + $0x10] sm:$0xff] }
  0x33   : > { %v2178_v3 = vld [vmem:[%s168_s16 + $0x18] sm:$0xff]  ;;  %v2180_v4 = vld [vmem:[%s168_s16 + $0x20] sm:$0xff]  ;;  %v2182_v5 = vld [vmem:[%s168_s16 + $0x28] sm:$0xff] }
  0x34   : > { %v2184_v6 = vld [vmem:[%s168_s16 + $0x30] sm:$0xff]  ;;  %v2186_v7 = vld [vmem:[%s168_s16 + $0x38] sm:$0xff] }
  0x35 LB: >> { %s2195_s22 = sshll.u32 %s2071_s21, 4  ;;  %vm210_vm0 = vcmask 130048   ;;  %vm967_vm1 = vcmask 1041409   ;;  %vm969_vm2 = vcmask 1042434   ;;  %vm971_vm3 = vcmask 1043459   ;;  %s2071_s21 = sphi %s2189_s21, %s187_s21  }
  0x36   : >> { %s189_s23 = sld [smem:[#allocation3 + %s2195_s22]]  ;;  %s235_s28 = sadd.s32 1, %s2195_s22  ;;  %vm973_vm4 = vcmask 1044484   ;;  %vm975_vm5 = vcmask 1045509   ;;  %vm977_vm6 = vcmask 1046534   ;;  %vm979_vm7 = vcmask 1047559  }
  0x37   : >> { %s190_s0 = sld [smem:[#allocation4 + %s2195_s22]]  ;;  %s281_s16 = sadd.s32 2, %s2195_s22  ;;  %vm1717_vm8 = vcmask 64512   ;;  %vm1720_vm9 = vcmask 195584   ;;  %vm1722_vm10 = vcmask 261120   ;;  %vm1724_vm11 = vcmask 326656  }
  0x38   : >> { %s236_s30 = sld [smem:[#allocation3 + %s235_s28]]  ;;  %vm1726_vm12 = vcmask 392192   ;;  %vm1728_vm13 = vcmask 457728   ;;  %vm1730_vm14 = vcmask 523264   ;;  %vm1732_vm15 = vcmask 588800  }
  0x39   : >> { %s237_s5 = sld [smem:[#allocation4 + %s235_s28]] }
  0x3a   : >> { %s282_s18 = sld [smem:[#allocation3 + %s281_s16]] }
  0x3c   : >> { %s1900_s11 = sshll.u32 %s189_s23, 4  ;;  %s283_s23 = sld [smem:[#allocation4 + %s281_s16]] }
  0x3d   : >> { %s192_s12 = sadd.s32 %s1900_s11, %s190_s0 }
  0x3e   : >> { %s193_s13 = scalar_lea.vmem %s2170_s19, %s192_s12  ;;  %s1901_s14 = sshll.u32 %s236_s30, 4 }
  0x3f   : >> { %v196_v8 = vld [vmem:[%s193_s13 + $0x20] sm:$0xff]  ;;  %v197_v10 = vld [vmem:[%s193_s13 + $0x30] sm:$0xff]  ;;  %s239_s15 = sadd.s32 %s1901_s14, %s237_s5  ;;  %s327_s30 = sadd.s32 3, %s2195_s22 }
  0x40   : >> { %v194_v9 = vld [vmem:[%s193_s13] sm:$0xff]  ;;  %v204_v11 = vmul.f32 %v196_v8, %v2176_v2  ;;  %v205_v13 = vmul.f32 %v197_v10, %v2178_v3  ;;  %v195_v14 = vld [vmem:[%s193_s13 + $0x10] sm:$0xff]  ;;  %s2213_s17 = scalar_lea.vmem %s2170_s19, %s239_s15  ;;  %s1902_s0 = sshll.u32 %s282_s18, 4 }
  0x41   : >> { %v202_v12 = vmul.f32 %v194_v9, %v2172_v0  ;;  %v203_v15 = vmul.f32 %v195_v14, %v2174_v1  ;;  %v199_v16 = vld [vmem:[%s193_s13 + $0x50] sm:$0xff]  ;;  %v198_v17 = vld [vmem:[%s193_s13 + $0x40] sm:$0xff]  ;;  %s328_s11 = sld [smem:[#allocation3 + %s327_s30]]  ;;  %s373_s15 = sadd.s32 4, %s2195_s22 }
  0x42   : >> { %v217_v18 = vsel %vm210_vm0, %v204_v11, 0.0  ;;  %v220_v20 = vsel %vm210_vm0, %v205_v13, 0.0  ;;  %v207_v22 = vmul.f32 %v199_v16, %v2182_v5  ;;  %v206_v23 = vmul.f32 %v198_v17, %v2180_v4  ;;  %v201_v24 = vld [vmem:[%s193_s13 + $0x70] sm:$0xff]  ;;  %v200_v25 = vld [vmem:[%s193_s13 + $0x60] sm:$0xff]  ;;  %s285_s28 = sadd.s32 %s1902_s0, %s283_s23  ;;  %s329_s12 = sld [smem:[#allocation4 + %s327_s30]] }
  0x43   : >> { %v211_v19 = vsel %vm210_vm0, %v202_v12, 0.0  ;;  %218 = vadd.xlane.f32.xlu1 %v217_v18  ;;  %v214_v21 = vsel %vm210_vm0, %v203_v15, 0.0  ;;  %v209_v28 = vmul.f32 %v201_v24, %v2186_v7  ;;  %v208_v29 = vmul.f32 %v200_v25, %v2184_v6  ;;  %v242_v30 = vld [vmem:[%s2213_s17 + $0x10] sm:$0xff]  ;;  %v241_v31 = vld [vmem:[%s2213_s17] sm:$0xff]  ;;  %s2241_s5 = scalar_lea.vmem %s2170_s19, %s285_s28  ;;  %s375_s18 = sld [smem:[#allocation4 + %s373_s15]] }
  0x44   : >> { %212 = vadd.xlane.f32.xlu0 %v211_v19  ;;  %v226_v26 = vsel %vm210_vm0, %v207_v22, 0.0  ;;  %v223_v27 = vsel %vm210_vm0, %v206_v23, 0.0  ;;  %v250_v34 = vmul.f32 %v242_v30, %v2174_v1  ;;  %v249_v35 = vmul.f32 %v241_v31, %v2172_v0  ;;  %v244_v36 = vld [vmem:[%s2213_s17 + $0x30] sm:$0xff]  ;;  %v243_v37 = vld [vmem:[%s2213_s17 + $0x20] sm:$0xff]  ;;  %s419_s28 = sadd.s32 5, %s2195_s22 }
  0x45   : >> { %v232_v32 = vsel %vm210_vm0, %v209_v28, 0.0  ;;  %v229_v33 = vsel %vm210_vm0, %v208_v29, 0.0  ;;  %v252_v40 = vmul.f32 %v244_v36, %v2178_v3  ;;  %v251_v41 = vmul.f32 %v243_v37, %v2176_v2  ;;  %v246_v42 = vld [vmem:[%s2213_s17 + $0x50] sm:$0xff]  ;;  %v245_v43 = vld [vmem:[%s2213_s17 + $0x40] sm:$0xff] }
  0x46   : >> { %v260_v38 = vsel %vm210_vm0, %v250_v34, 0.0  ;;  %v257_v39 = vsel %vm210_vm0, %v249_v35, 0.0  ;;  %v254_v46 = vmul.f32 %v246_v42, %v2182_v5  ;;  %v253_v47 = vmul.f32 %v245_v43, %v2180_v4  ;;  %v248_v48 = vld [vmem:[%s2213_s17 + $0x70] sm:$0xff]  ;;  %v247_v49 = vld [vmem:[%s2213_s17 + $0x60] sm:$0xff]  ;;  %s374_s17 = sld [smem:[#allocation3 + %s373_s15]] }
  0x47   : >> { %221 = vadd.xlane.f32.xlu1 %v220_v20  ;;  %v266_v44 = vsel %vm210_vm0, %v252_v40, 0.0  ;;  %v263_v45 = vsel %vm210_vm0, %v251_v41, 0.0  ;;  %v256_v52 = vmul.f32 %v248_v48, %v2186_v7  ;;  %v255_v53 = vmul.f32 %v247_v49, %v2184_v6  ;;  %v288_v54 = vld [vmem:[%s2241_s5 + $0x10] sm:$0xff]  ;;  %v287_v55 = vld [vmem:[%s2241_s5] sm:$0xff]  ;;  %s1903_s13 = sshll.u32 %s328_s11, 4  ;;  %s421_s11 = sld [smem:[#allocation4 + %s419_s28]] }
  0x48   : >> { %215 = vadd.xlane.f32.xlu0 %v214_v21  ;;  %v272_v50 = vsel %vm210_vm0, %v254_v46, 0.0  ;;  %v269_v51 = vsel %vm210_vm0, %v253_v47, 0.0  ;;  %v296_v58 = vmul.f32 %v288_v54, %v2174_v1  ;;  %v295_v59 = vmul.f32 %v287_v55, %v2172_v0  ;;  %v290_v60 = vld [vmem:[%s2241_s5 + $0x30] sm:$0xff]  ;;  %v289_v61 = vld [vmem:[%s2241_s5 + $0x20] sm:$0xff]  ;;  %s331_s14 = sadd.s32 %s1903_s13, %s329_s12 }
  0x49   : >> { %v278_v56 = vsel %vm210_vm0, %v256_v52, 0.0  ;;  %v275_v57 = vsel %vm210_vm0, %v255_v53, 0.0  ;;  %v298_v8 = vmul.f32 %v290_v60, %v2178_v3  ;;  %v297_v9 = vmul.f32 %v289_v61, %v2176_v2  ;;  %v292_v10 = vld [vmem:[%s2241_s5 + $0x50] sm:$0xff]  ;;  %v291_v11 = vld [vmem:[%s2241_s5 + $0x40] sm:$0xff]  ;;  %s2269_s16 = scalar_lea.vmem %s2170_s19, %s331_s14  ;;  %s465_s14 = sadd.s32 6, %s2195_s22 }
  0x4a   : >> { %v306_v62 = vsel %vm210_vm0, %v296_v58, 0.0  ;;  %v303_v63 = vsel %vm210_vm0, %v295_v59, 0.0  ;;  %v300_v14 = vmul.f32 %v292_v10, %v2182_v5  ;;  %v299_v15 = vmul.f32 %v291_v11, %v2180_v4  ;;  %v294_v16 = vld [vmem:[%s2241_s5 + $0x70] sm:$0xff]  ;;  %v293_v17 = vld [vmem:[%s2241_s5 + $0x60] sm:$0xff]  ;;  %s420_s5 = sld [smem:[#allocation3 + %s419_s28]] }
  0x4b   : >> { %227 = vadd.xlane.f32.xlu1 %v226_v26  ;;  %v312_v12 = vsel %vm210_vm0, %v298_v8, 0.0  ;;  %v309_v13 = vsel %vm210_vm0, %v297_v9, 0.0  ;;  %v302_v20 = vmul.f32 %v294_v16, %v2186_v7  ;;  %v301_v21 = vmul.f32 %v293_v17, %v2184_v6  ;;  %v334_v22 = vld [vmem:[%s2269_s16 + $0x10] sm:$0xff]  ;;  %v333_v23 = vld [vmem:[%s2269_s16] sm:$0xff] }
  0x4c   : >> { %224 = vadd.xlane.f32.xlu0 %v223_v27  ;;  %v318_v18 = vsel %vm210_vm0, %v300_v14, 0.0  ;;  %v315_v19 = vsel %vm210_vm0, %v299_v15, 0.0  ;;  %v342_v26 = vmul.f32 %v334_v22, %v2174_v1  ;;  %v341_v27 = vmul.f32 %v333_v23, %v2172_v0  ;;  %v336_v28 = vld [vmem:[%s2269_s16 + $0x30] sm:$0xff]  ;;  %v335_v29 = vld [vmem:[%s2269_s16 + $0x20] sm:$0xff]  ;;  %s1904_s23 = sshll.u32 %s374_s17, 4  ;;  %s467_s17 = sld [smem:[#allocation4 + %s465_s14]] }
  0x4d   : >> { %v324_v24 = vsel %vm210_vm0, %v302_v20, 0.0  ;;  %v321_v25 = vsel %vm210_vm0, %v301_v21, 0.0  ;;  %v338_v34 = vld [vmem:[%s2269_s16 + $0x50] sm:$0xff]  ;;  %v337_v35 = vld [vmem:[%s2269_s16 + $0x40] sm:$0xff]  ;;  %s377_s0 = sadd.s32 %s1904_s23, %s375_s18 }
  0x4e   : >> { %v352_v30 = vsel %vm210_vm0, %v342_v26, 0.0  ;;  %v349_v31 = vsel %vm210_vm0, %v341_v27, 0.0  ;;  %v340_v40 = vld [vmem:[%s2269_s16 + $0x70] sm:$0xff]  ;;  %v339_v41 = vld [vmem:[%s2269_s16 + $0x60] sm:$0xff]  ;;  %s2297_s30 = scalar_lea.vmem %s2170_s19, %s377_s0  ;;  %s466_s16 = sld [smem:[#allocation3 + %s465_s14]] }
  0x4f   : >> { %233 = vadd.xlane.f32.xlu1 %v232_v32  ;;  %v344_v32 = vmul.f32 %v336_v28, %v2178_v3  ;;  %v380_v46 = vld [vmem:[%s2297_s30 + $0x10] sm:$0xff]  ;;  %v379_v47 = vld [vmem:[%s2297_s30] sm:$0xff]  ;;  %s511_s0 = sadd.s32 7, %s2195_s22 }
  0x50   : >> { %230 = vadd.xlane.f32.xlu0 %v229_v33  ;;  %v343_v33 = vmul.f32 %v335_v29, %v2176_v2  ;;  %v382_v52 = vld [vmem:[%s2297_s30 + $0x30] sm:$0xff]  ;;  %v381_v53 = vld [vmem:[%s2297_s30 + $0x20] sm:$0xff]  ;;  %s1905_s12 = sshll.u32 %s420_s5, 4  ;;  %s513_s5 = sld [smem:[#allocation4 + %s511_s0]] }
  0x51   : >> { %v358_v36 = vsel %vm210_vm0, %v344_v32, 0.0  ;;  %v384_v58 = vld [vmem:[%s2297_s30 + $0x50] sm:$0xff]  ;;  %v383_v59 = vld [vmem:[%s2297_s30 + $0x40] sm:$0xff]  ;;  %s423_s13 = sadd.s32 %s1905_s12, %s421_s11 }
  0x52   : >> { %v355_v37 = vsel %vm210_vm0, %v343_v33, 0.0  ;;  %v386_v8 = vld [vmem:[%s2297_s30 + $0x70] sm:$0xff]  ;;  %v385_v9 = vld [vmem:[%s2297_s30 + $0x60] sm:$0xff]  ;;  %s2325_s15 = scalar_lea.vmem %s2170_s19, %s423_s13  ;;  %s512_s30 = sld [smem:[#allocation3 + %s511_s0]] }
  0x53   : >> { %261 = vadd.xlane.f32.xlu1 %v260_v38  ;;  %v346_v38 = vmul.f32 %v338_v34, %v2182_v5  ;;  %v426_v14 = vld [vmem:[%s2325_s15 + $0x10] sm:$0xff]  ;;  %v425_v15 = vld [vmem:[%s2325_s15] sm:$0xff]  ;;  %s557_s13 = sadd.s32 8, %s2195_s22 }
  0x54   : >> { %258 = vadd.xlane.f32.xlu0 %v257_v39  ;;  %v345_v39 = vmul.f32 %v337_v35, %v2180_v4  ;;  %v428_v20 = vld [vmem:[%s2325_s15 + $0x30] sm:$0xff]  ;;  %v427_v21 = vld [vmem:[%s2325_s15 + $0x20] sm:$0xff]  ;;  %s1906_s18 = sshll.u32 %s466_s16, 4  ;;  %s559_s16 = sld [smem:[#allocation4 + %s557_s13]] }
  0x55   : >> { %v364_v42 = vsel %vm210_vm0, %v346_v38, 0.0  ;;  %v430_v26 = vld [vmem:[%s2325_s15 + $0x50] sm:$0xff]  ;;  %v429_v27 = vld [vmem:[%s2325_s15 + $0x40] sm:$0xff]  ;;  %s469_s23 = sadd.s32 %s1906_s18, %s467_s17 }
  0x56   : >> { %v361_v43 = vsel %vm210_vm0, %v345_v39, 0.0  ;;  %v432_v32 = vld [vmem:[%s2325_s15 + $0x70] sm:$0xff]  ;;  %v431_v33 = vld [vmem:[%s2325_s15 + $0x60] sm:$0xff]  ;;  %s2353_s28 = scalar_lea.vmem %s2170_s19, %s469_s23  ;;  %s558_s15 = sld [smem:[#allocation3 + %s557_s13]] }
  0x57   : >> { %267 = vadd.xlane.f32.xlu1 %v266_v44  ;;  %v348_v44 = vmul.f32 %v340_v40, %v2186_v7  ;;  %v472_v38 = vld [vmem:[%s2353_s28 + $0x10] sm:$0xff]  ;;  %v471_v39 = vld [vmem:[%s2353_s28] sm:$0xff]  ;;  %s603_s23 = sadd.s32 9, %s2195_s22 }
  0x58   : >> { %264 = vadd.xlane.f32.xlu0 %v263_v45  ;;  %v347_v45 = vmul.f32 %v339_v41, %v2184_v6  ;;  %s1907_s11 = sshll.u32 %s512_s30, 4  ;;  %s605_s30 = sld [smem:[#allocation4 + %s603_s23]] }
  0x59   : >> { %v370_v48 = vsel %vm210_vm0, %v348_v44, 0.0  ;;  %v474_v44 = vld [vmem:[%s2353_s28 + $0x30] sm:$0xff]  ;;  %s515_s12 = sadd.s32 %s1907_s11, %s513_s5 }
  0x5a   : >> { %v367_v49 = vsel %vm210_vm0, %v347_v45, 0.0  ;;  %v473_v45 = vld [vmem:[%s2353_s28 + $0x20] sm:$0xff]  ;;  %s2381_s14 = scalar_lea.vmem %s2170_s19, %s515_s12  ;;  %s649_s12 = sadd.s32 10, %s2195_s22 }
  0x5b   : >> { %273 = vadd.xlane.f32.xlu1 %v272_v50  ;;  %v388_v50 = vmul.f32 %v380_v46, %v2174_v1 }
  0x5c   : >> { %270 = vadd.xlane.f32.xlu0 %v269_v51  ;;  %v387_v51 = vmul.f32 %v379_v47, %v2172_v0  ;;  %s1908_s17 = sshll.u32 %s558_s15, 4  ;;  %s651_s15 = sld [smem:[#allocation4 + %s649_s12]] }
  0x5d   : >> { %v398_v54 = vsel %vm210_vm0, %v388_v50, 0.0  ;;  %v476_v50 = vld [vmem:[%s2353_s28 + $0x50] sm:$0xff]  ;;  %s561_s18 = sadd.s32 %s1908_s17, %s559_s16  ;;  %s695_s16 = sadd.s32 11, %s2195_s22 }
  0x5e   : >> { %v395_v55 = vsel %vm210_vm0, %v387_v51, 0.0  ;;  %v475_v51 = vld [vmem:[%s2353_s28 + $0x40] sm:$0xff]  ;;  %s2409_s0 = scalar_lea.vmem %s2170_s19, %s561_s18  ;;  %s2458_s17 = sld [smem:[#allocation3 + %s695_s16]] }
  0x5f   : >> { %279 = vadd.xlane.f32.xlu1 %v278_v56  ;;  %v390_v56 = vmul.f32 %v382_v52, %v2178_v3 }
  0x60   : >> { %276 = vadd.xlane.f32.xlu0 %v275_v57  ;;  %v389_v57 = vmul.f32 %v381_v53, %v2176_v2 }
  0x61   : >> { %v404_v60 = vsel %vm210_vm0, %v390_v56, 0.0  ;;  %v478_v56 = vld [vmem:[%s2353_s28 + $0x70] sm:$0xff] }
  0x62   : >> { %v401_v61 = vsel %vm210_vm0, %v389_v57, 0.0  ;;  %v477_v57 = vld [vmem:[%s2353_s28 + $0x60] sm:$0xff]  ;;  %s604_s28 = sld [smem:[#allocation3 + %s603_s23]] }
  0x63   : >> { %307 = vadd.xlane.f32.xlu1 %v306_v62  ;;  %v392_v62 = vmul.f32 %v384_v58, %v2182_v5  ;;  %s2471_s23 = sld [smem:[#allocation4 + %s695_s16]] }
  0x64   : >> { %304 = vadd.xlane.f32.xlu0 %v303_v63  ;;  %v391_v63 = vmul.f32 %v383_v59, %v2180_v4 }
  0x65   : >> { %v410_v10 = vsel %vm210_vm0, %v392_v62, 0.0  ;;  %v518_v62 = vld [vmem:[%s2381_s14 + $0x10] sm:$0xff] }
  0x66   : >> { %v407_v11 = vsel %vm210_vm0, %v391_v63, 0.0  ;;  %v517_v63 = vld [vmem:[%s2381_s14] sm:$0xff] }
  0x67   : >> { %313 = vadd.xlane.f32.xlu1 %v312_v12  ;;  %v394_v12 = vmul.f32 %v386_v8, %v2186_v7 }
  0x68   : >> { %310 = vadd.xlane.f32.xlu0 %v309_v13  ;;  %v393_v13 = vmul.f32 %v385_v9, %v2184_v6  ;;  %s1909_s5 = sshll.u32 %s604_s28, 4  ;;  %s741_s28 = sadd.s32 12, %s2195_s22 }
  0x69   : >> { %v416_v16 = vsel %vm210_vm0, %v394_v12, 0.0  ;;  %v520_v12 = vld [vmem:[%s2381_s14 + $0x30] sm:$0xff]  ;;  %s607_s11 = sadd.s32 %s1909_s5, %s605_s30  ;;  %s1911_s5 = sshll.u32 %s2458_s17, 4 }
  0x6a   : >> { %v413_v17 = vsel %vm210_vm0, %v393_v13, 0.0  ;;  %v519_v13 = vld [vmem:[%s2381_s14 + $0x20] sm:$0xff]  ;;  %s2437_s13 = scalar_lea.vmem %s2170_s19, %s607_s11  ;;  %s2492_s11 = sld [smem:[#allocation3 + %s741_s28]] }
  0x6b   : >> { %319 = vadd.xlane.f32.xlu1 %v318_v18  ;;  %v434_v18 = vmul.f32 %v426_v14, %v2174_v1 }
  0x6c   : >> { %316 = vadd.xlane.f32.xlu0 %v315_v19  ;;  %v433_v19 = vmul.f32 %v425_v15, %v2172_v0 }
  0x6d   : >> { %v444_v22 = vsel %vm210_vm0, %v434_v18, 0.0  ;;  %v522_v18 = vld [vmem:[%s2381_s14 + $0x50] sm:$0xff] }
  0x6e   : >> { %v441_v23 = vsel %vm210_vm0, %v433_v19, 0.0  ;;  %v521_v19 = vld [vmem:[%s2381_s14 + $0x40] sm:$0xff] }
  0x6f   : >> { %325 = vadd.xlane.f32.xlu1 %v324_v24  ;;  %v436_v24 = vmul.f32 %v428_v20, %v2178_v3 }
  0x70   : >> { %322 = vadd.xlane.f32.xlu0 %v321_v25  ;;  %v435_v25 = vmul.f32 %v427_v21, %v2176_v2  ;;  %s1912_s16 = sshll.u32 %s2492_s11, 4 }
  0x71   : >> { %v450_v28 = vsel %vm210_vm0, %v436_v24, 0.0  ;;  %v524_v24 = vld [vmem:[%s2381_s14 + $0x70] sm:$0xff] }
  0x72   : >> { %v447_v29 = vsel %vm210_vm0, %v435_v25, 0.0  ;;  %v523_v25 = vld [vmem:[%s2381_s14 + $0x60] sm:$0xff]  ;;  %s2443_s14 = sld [smem:[#allocation3 + %s649_s12]]  ;;  %s699_s12 = sadd.s32 %s1911_s5, %s2471_s23 }
  0x73   : >> { %353 = vadd.xlane.f32.xlu1 %v352_v30  ;;  %v438_v30 = vmul.f32 %v430_v26, %v2182_v5  ;;  %s833_s5 = sadd.s32 14, %s2195_s22 }
  0x74   : >> { %350 = vadd.xlane.f32.xlu0 %v349_v31  ;;  %v437_v31 = vmul.f32 %v429_v27, %v2180_v4 }
  0x75   : >> { %v456_v34 = vsel %vm210_vm0, %v438_v30, 0.0  ;;  %v564_v30 = vld [vmem:[%s2409_s0 + $0x10] sm:$0xff] }
  0x76   : >> { %v453_v35 = vsel %vm210_vm0, %v437_v31, 0.0  ;;  %v563_v31 = vld [vmem:[%s2409_s0] sm:$0xff] }
  0x77   : >> { %359 = vadd.xlane.f32.xlu1 %v358_v36  ;;  %v440_v36 = vmul.f32 %v432_v32, %v2186_v7 }
  0x78   : >> { %356 = vadd.xlane.f32.xlu0 %v355_v37  ;;  %v439_v37 = vmul.f32 %v431_v33, %v2184_v6  ;;  %s1910_s18 = sshll.u32 %s2443_s14, 4  ;;  %s787_s14 = sadd.s32 13, %s2195_s22 }
  0x79   : >> { %v462_v40 = vsel %vm210_vm0, %v440_v36, 0.0  ;;  %v566_v36 = vld [vmem:[%s2409_s0 + $0x30] sm:$0xff]  ;;  %s2529_s17 = sld [smem:[#allocation3 + %s787_s14]] }
  0x7a   : >> { %v459_v41 = vsel %vm210_vm0, %v439_v37, 0.0  ;;  %v565_v37 = vld [vmem:[%s2409_s0 + $0x20] sm:$0xff]  ;;  %s2542_s23 = sld [smem:[#allocation4 + %s787_s14]] }
  0x7b   : >> { %365 = vadd.xlane.f32.xlu1 %v364_v42  ;;  %v480_v42 = vmul.f32 %v472_v38, %v2174_v1  ;;  %s2590_s14 = sld [smem:[#allocation4 + %s833_s5]] }
  0x7c   : >> { %362 = vadd.xlane.f32.xlu0 %v361_v43  ;;  %v479_v43 = vmul.f32 %v471_v39, %v2172_v0 }
  0x7d   : >> { %v490_v46 = vsel %vm210_vm0, %v480_v42, 0.0  ;;  %v568_v42 = vld [vmem:[%s2409_s0 + $0x50] sm:$0xff] }
  0x7e   : >> { %v487_v47 = vsel %vm210_vm0, %v479_v43, 0.0  ;;  %v567_v43 = vld [vmem:[%s2409_s0 + $0x40] sm:$0xff] }
  0x7f   : >> { %371 = vadd.xlane.f32.xlu1 %v370_v48  ;;  %v482_v48 = vmul.f32 %v474_v44, %v2178_v3 }
  0x80   : >> { %368 = vadd.xlane.f32.xlu0 %v367_v49  ;;  %v481_v49 = vmul.f32 %v473_v45, %v2176_v2 }
  0x81   : >> { %v496_v52 = vsel %vm210_vm0, %v482_v48, 0.0  ;;  %v570_v48 = vld [vmem:[%s2409_s0 + $0x70] sm:$0xff] }
  0x82   : >> { %v493_v53 = vsel %vm210_vm0, %v481_v49, 0.0  ;;  %v569_v49 = vld [vmem:[%s2409_s0 + $0x60] sm:$0xff]  ;;  %s653_s0 = sadd.s32 %s1910_s18, %s651_s15  ;;  %s2524_s15 = scalar_lea.vmem %s2170_s19, %s699_s12 }
  0x83   : >> { %399 = vadd.xlane.f32.xlu1 %v398_v54  ;;  %v484_v54 = vmul.f32 %v476_v50, %v2182_v5  ;;  %s2485_s30 = scalar_lea.vmem %s2170_s19, %s653_s0  ;;  %s2576_s12 = sld [smem:[#allocation3 + %s833_s5]] }
  0x84   : >> { %396 = vadd.xlane.f32.xlu0 %v395_v55  ;;  %v483_v55 = vmul.f32 %v475_v51, %v2180_v4 }
  0x85   : >> { %v502_v58 = vsel %vm210_vm0, %v484_v54, 0.0  ;;  %v933_v54 = vlaneseq }
  0x86   : >> { %v499_v59 = vsel %vm210_vm0, %v483_v55, 0.0  ;;  %v610_v55 = vld [vmem:[%s2437_s13 + $0x10] sm:$0xff] }
  0x87   : >> { %405 = vadd.xlane.f32.xlu1 %v404_v60  ;;  %v486_v60 = vmul.f32 %v478_v56, %v2186_v7  ;;  %v609_v56 = vld [vmem:[%s2437_s13] sm:$0xff] }
  0x88   : >> { %402 = vadd.xlane.f32.xlu0 %v401_v61  ;;  %v485_v61 = vmul.f32 %v477_v57, %v2184_v6 }
  0x89   : >> { %v508_v8 = vsel %vm210_vm0, %v486_v60, 0.0  ;;  %v617_v60 = vmul.f32 %v609_v56, %v2172_v0  ;;  %v657_v56 = vld [vmem:[%s2485_s30 + $0x20] sm:$0xff] }
  0x8a   : >> { %v505_v9 = vsel %vm210_vm0, %v485_v61, 0.0  ;;  %v2452_v61 = vand.u32 127, %v933_v54 }
  0x8b   : >> { %411 = vadd.xlane.f32.xlu1 %v410_v10  ;;  %v526_v10 = vmul.f32 %v518_v62, %v2174_v1  ;;  %v2454_v62 = vshrl.u32 %v933_v54, 7 }
  0x8c   : >> { %408 = vadd.xlane.f32.xlu0 %v407_v11  ;;  %v525_v11 = vmul.f32 %v517_v63, %v2172_v0  ;;  %v612_v63 = vld [vmem:[%s2437_s13 + $0x30] sm:$0xff] }
  0x8d   : >> { %v536_v14 = vsel %vm210_vm0, %v526_v10, 0.0 }
  0x8e   : >> { %v533_v15 = vsel %vm210_vm0, %v525_v11, 0.0 }
  0x8f   : >> { %417 = vadd.xlane.f32.xlu1 %v416_v16  ;;  %v528_v16 = vmul.f32 %v520_v12, %v2178_v3  ;;  %v625_v12 = vsel %vm210_vm0, %v617_v60, 0.0 }
  0x90   : >> { %414 = vadd.xlane.f32.xlu0 %v413_v17  ;;  %v527_v17 = vmul.f32 %v519_v13, %v2176_v2  ;;  %v620_v13 = vmul.f32 %v612_v63, %v2178_v3 }
  0x91   : >> { %v542_v20 = vsel %vm210_vm0, %v528_v16, 0.0  ;;  %v614_v16 = vld [vmem:[%s2437_s13 + $0x50] sm:$0xff] }
  0x92   : >> { %v539_v21 = vsel %vm210_vm0, %v527_v17, 0.0  ;;  %v613_v17 = vld [vmem:[%s2437_s13 + $0x40] sm:$0xff] }
  0x93   : >> { %445 = vadd.xlane.f32.xlu1 %v444_v22  ;;  %v530_v22 = vmul.f32 %v522_v18, %v2182_v5 }
  0x94   : >> { %442 = vadd.xlane.f32.xlu0 %v441_v23  ;;  %v529_v23 = vmul.f32 %v521_v19, %v2180_v4 }
  0x95   : >> { %v548_v26 = vsel %vm210_vm0, %v530_v22, 0.0  ;;  %v622_v22 = vmul.f32 %v614_v16, %v2182_v5 }
  0x96   : >> { %v545_v27 = vsel %vm210_vm0, %v529_v23, 0.0  ;;  %v621_v23 = vmul.f32 %v613_v17, %v2180_v4 }
  0x97   : >> { %451 = vadd.xlane.f32.xlu1 %v450_v28  ;;  %v532_v28 = vmul.f32 %v524_v24, %v2186_v7  ;;  %v616_v24 = vld [vmem:[%s2437_s13 + $0x70] sm:$0xff] }
  0x98   : >> { %448 = vadd.xlane.f32.xlu0 %v447_v29  ;;  %v531_v29 = vmul.f32 %v523_v25, %v2184_v6 }
  0x99   : >> { %v554_v32 = vsel %vm210_vm0, %v532_v28, 0.0  ;;  %v615_v28 = vld [vmem:[%s2437_s13 + $0x60] sm:$0xff] }
  0x9a   : >> { %v551_v33 = vsel %vm210_vm0, %v531_v29, 0.0 }
  0x9b   : >> { %457 = vadd.xlane.f32.xlu1 %v456_v34  ;;  %v572_v34 = vmul.f32 %v564_v30, %v2174_v1 }
  0x9c   : >> { %454 = vadd.xlane.f32.xlu0 %v453_v35  ;;  %v571_v35 = vmul.f32 %v563_v31, %v2172_v0  ;;  %v624_v31 = vmul.f32 %v616_v24, %v2186_v7  ;;  %v703_v24 = vld [vmem:[%s2524_s15 + $0x20] sm:$0xff] }
  0x9d   : >> { %v582_v38 = vsel %vm210_vm0, %v572_v34, 0.0 }
  0x9e   : >> { %v579_v39 = vsel %vm210_vm0, %v571_v35, 0.0  ;;  %v640_v35 = vsel %vm210_vm0, %v622_v22, 0.0 }
  0x9f   : >> { %463 = vadd.xlane.f32.xlu1 %v462_v40  ;;  %v574_v40 = vmul.f32 %v566_v36, %v2178_v3  ;;  %v637_v36 = vsel %vm210_vm0, %v621_v23, 0.0 }
  0xa0   : >> { %460 = vadd.xlane.f32.xlu0 %v459_v41  ;;  %v573_v41 = vmul.f32 %v565_v37, %v2176_v2  ;;  %v623_v37 = vmul.f32 %v615_v28, %v2184_v6 }
  0xa1   : >> { %v588_v44 = vsel %vm210_vm0, %v574_v40, 0.0 }
  0xa2   : >> { %v585_v45 = vsel %vm210_vm0, %v573_v41, 0.0  ;;  %v990_v41 = vadd.s32 4294967288, %v2452_v61 }
  0xa3   : >> { %491 = vadd.xlane.f32.xlu1 %v490_v46  ;;  %v576_v46 = vmul.f32 %v568_v42, %v2182_v5  ;;  %v656_v42 = vld [vmem:[%s2485_s30 + $0x10] sm:$0xff] }
  0xa4   : >> { %488 = vadd.xlane.f32.xlu0 %v487_v47  ;;  %v575_v47 = vmul.f32 %v567_v43, %v2180_v4  ;;  %v655_v43 = vld [vmem:[%s2485_s30] sm:$0xff] }
  0xa5   : >> { %v594_v50 = vsel %vm210_vm0, %v576_v46, 0.0 }
  0xa6   : >> { %v591_v51 = vsel %vm210_vm0, %v575_v47, 0.0 }
  0xa7   : >> { %497 = vadd.xlane.f32.xlu1 %v496_v52  ;;  %v578_v52 = vmul.f32 %v570_v48, %v2186_v7 }
  0xa8   : >> { %494 = vadd.xlane.f32.xlu0 %v493_v53  ;;  %v577_v53 = vmul.f32 %v569_v49, %v2184_v6  ;;  %v643_v49 = vsel %vm210_vm0, %v623_v37, 0.0  ;;  %v1039_v37 = vadd.s32 4294967280, %v2452_v61 }
  0xa9   : >> { %v600_v57 = vsel %vm210_vm0, %v578_v52, 0.0  ;;  %v658_v52 = vld [vmem:[%s2485_s30 + $0x30] sm:$0xff] }
  0xab   : >> { %503 = vadd.xlane.f32.xlu1 %v502_v58  ;;  %v597_v58 = vsel %vm210_vm0, %v577_v53, 0.0 }
  0xac   : >> { %500 = vadd.xlane.f32.xlu0 %v499_v59  ;;  %v618_v59 = vmul.f32 %v610_v55, %v2174_v1  ;;  %v2520_v55 = vsub.s32 %v990_v41, %v2454_v62 }
  0xae   : >> { %v628_v11 = vsel %vm210_vm0, %v618_v59, 0.0 }
  0xaf   : >> { %509 = vadd.xlane.f32.xlu1 %v508_v8  ;;  %v611_v8 = vld [vmem:[%s2437_s13 + $0x20] sm:$0xff]  ;;  %s2507_s13 = sld [smem:[#allocation4 + %s741_s28]]  ;;  %s1913_s28 = sshll.u32 %s2529_s17, 4 }
  0xb0   : >> { %506 = vadd.xlane.f32.xlu0 %v505_v9  ;;  %s791_s11 = sadd.s32 %s1913_s28, %s2542_s23  ;;  %s879_s17 = sadd.s32 15, %s2195_s22 }
  0xb1   : >> { %s2617_s23 = sld [smem:[#allocation3 + %s879_s17]] }
  0xb2   : >> { %s2631_s28 = sld [smem:[#allocation4 + %s879_s17]] }
  0xb3   : >> { %537 = vadd.xlane.f32.xlu1 %v536_v14  ;;  %v619_v14 = vmul.f32 %v611_v8, %v2176_v2 }
  0xb4   : >> { %534 = vadd.xlane.f32.xlu0 %v533_v15  ;;  %v2467_v15 = vsub.s32 %v2452_v61, %v2454_v62 }
  0xb5   : >> { %s745_s18 = sadd.s32 %s1912_s16, %s2507_s13  ;;  %s2586_s13 = scalar_lea.vmem %s2170_s19, %s791_s11 }
  0xb6   : >> { %s2554_s0 = scalar_lea.vmem %s2170_s19, %s745_s18  ;;  %s1914_s16 = sshll.u32 %s2576_s12, 4 }
  0xb7   : >> { %543 = vadd.xlane.f32.xlu1 %v542_v20  ;;  %v634_v20 = vsel %vm210_vm0, %v620_v13, 0.0  ;;  %s837_s18 = sadd.s32 %s1914_s16, %s2590_s14  ;;  %s1915_s5 = sshll.u32 %s2617_s23, 4 }
  0xb8   : >> { %540 = vadd.xlane.f32.xlu0 %v539_v21  ;;  %v631_v21 = vsel %vm210_vm0, %v619_v14, 0.0  ;;  %v659_v14 = vld [vmem:[%s2485_s30 + $0x40] sm:$0xff]  ;;  %s2629_s22 = scalar_lea.vmem %s2170_s19, %s837_s18  ;;  %s883_s11 = sadd.s32 %s1915_s5, %s2631_s28 }
  0xb9   : >> { %s2670_s12 = scalar_lea.vmem %s2170_s19, %s883_s11 }
  0xbb   : >> { %549 = vadd.xlane.f32.xlu1 %v548_v26 }
  0xbc   : >> { %546 = vadd.xlane.f32.xlu0 %v545_v27 }
  0xbf   : >> { %555 = vadd.xlane.f32.xlu1 %v554_v32 }
  0xc0   : >> { %552 = vadd.xlane.f32.xlu0 %v551_v33 }
  0xc3   : >> { %583 = vadd.xlane.f32.xlu1 %v582_v38 }
  0xc4   : >> { %580 = vadd.xlane.f32.xlu0 %v579_v39 }
  0xc7   : >> { %589 = vadd.xlane.f32.xlu1 %v588_v44 }
  0xc8   : >> { %586 = vadd.xlane.f32.xlu0 %v585_v45  ;;  %v646_v45 = vsel %vm210_vm0, %v624_v31, 0.0 }
  0xcb   : >> { %595 = vadd.xlane.f32.xlu1 %v594_v50  ;;  %v664_v50 = vmul.f32 %v656_v42, %v2174_v1 }
  0xcc   : >> { %592 = vadd.xlane.f32.xlu0 %v591_v51  ;;  %v663_v51 = vmul.f32 %v655_v43, %v2172_v0 }
  0xcd   : >> { %v674_v8 = vsel %vm210_vm0, %v664_v50, 0.0  ;;  %v749_v50 = vld [vmem:[%s2554_s0 + $0x20] sm:$0xff] }
  0xcf   : >> { %601 = vadd.xlane.f32.xlu1 %v600_v57 }
  0xd0   : >> { %598 = vadd.xlane.f32.xlu0 %v597_v58  ;;  %v219_v9 = vpop.xlane.xlu1 %218  ;;  %v666_v58 = vmul.f32 %v658_v52, %v2178_v3 }
  0xd1   : >> { %v213_v10 = vpop.xlane.xlu0 %212  ;;  %v946_v29 = vrot.slane %v219_v9, %v2467_v15  ;;  %v671_v9 = vsel %vm210_vm0, %v663_v51, 0.0  ;;  %v704_v51 = vld [vmem:[%s2524_s15 + $0x30] sm:$0xff] }
  0xd2   : >> { %v938_v25 = vrot.slane %v213_v10, %v2467_v15  ;;  %v665_v10 = vmul.f32 %v657_v56, %v2176_v2 }
  0xd3   : >> { %629 = vadd.xlane.f32.xlu1 %v628_v11  ;;  %v701_v11 = vld [vmem:[%s2524_s15] sm:$0xff] }
  0xd4   : >> { %626 = vadd.xlane.f32.xlu0 %v625_v12  ;;  %v222_v18 = vpop.xlane.xlu1 %221  ;;  %v709_v16 = vmul.f32 %v701_v11, %v2172_v0  ;;  %v793_v11 = vld [vmem:[%s2586_s13] sm:$0xff] }
  0xd5   : >> { %v216_v19 = vpop.xlane.xlu0 %215  ;;  %v950_v26 = vrot.slane %v222_v18, %v2467_v15 }
  0xd6   : >> { %v942_v27 = vrot.slane %v216_v19, %v2467_v15  ;;  %v680_v19 = vsel %vm210_vm0, %v666_v58, 0.0  ;;  %v757_v58 = vmul.f32 %v749_v50, %v2176_v2 }
  0xd7   : >> { %635 = vadd.xlane.f32.xlu1 %v634_v20  ;;  %v677_v20 = vsel %vm210_vm0, %v665_v10, 0.0 }
  0xd8   : >> { %v968_v30 = vsel %vm967_vm1, %v942_v27, %v938_v25  ;;  %632 = vadd.xlane.f32.xlu0 %v631_v21  ;;  %v228_v33 = vpop.xlane.xlu1 %227  ;;  %v667_v21 = vmul.f32 %v659_v14, %v2180_v4  ;;  %v702_v25 = vld [vmem:[%s2524_s15 + $0x10] sm:$0xff]  ;;  %v717_v27 = vsel %vm210_vm0, %v709_v16, 0.0  ;;  %v769_v16 = vsel %vm210_vm0, %v757_v58, 0.0 }
  0xd9   : >> { %v970_v32 = vsel %vm969_vm2, %v946_v29, %v968_v30  ;;  %v225_v34 = vpop.xlane.xlu0 %224  ;;  %v958_v38 = vrot.slane %v228_v33, %v2467_v15  ;;  %v710_v33 = vmul.f32 %v702_v25, %v2174_v1 }
  0xda   : >> { %v972_v39 = vsel %vm971_vm3, %v950_v26, %v970_v32  ;;  %v954_v40 = vrot.slane %v225_v34, %v2467_v15  ;;  %v683_v31 = vsel %vm210_vm0, %v667_v21, 0.0  ;;  %v711_v32 = vmul.f32 %v703_v24, %v2176_v2  ;;  %v748_v34 = vld [vmem:[%s2554_s0 + $0x10] sm:$0xff] }
  0xdb   : >> { %641 = vadd.xlane.f32.xlu1 %v640_v35  ;;  %v660_v21 = vld [vmem:[%s2485_s30 + $0x50] sm:$0xff] }
  0xdc   : >> { %v974_v44 = vsel %vm973_vm4, %v954_v40, %v972_v39  ;;  %638 = vadd.xlane.f32.xlu0 %v637_v36  ;;  %v234_v46 = vpop.xlane.xlu1 %233  ;;  %v756_v40 = vmul.f32 %v748_v34, %v2174_v1  ;;  %v750_v34 = vld [vmem:[%s2554_s0 + $0x30] sm:$0xff] }
  0xdd   : >> { %v976_v47 = vsel %vm975_vm5, %v958_v38, %v974_v44  ;;  %v231_v48 = vpop.xlane.xlu0 %230  ;;  %v966_v53 = vrot.slane %v234_v46, %v2467_v15  ;;  %v747_v38 = vld [vmem:[%s2554_s0] sm:$0xff]  ;;  %v723_v44 = vsel %vm210_vm0, %v711_v32, 0.0 }
  0xde   : >> { %v962_v54 = vrot.slane %v231_v48, %v2467_v15  ;;  %v755_v46 = vmul.f32 %v747_v38, %v2172_v0 }
  0xdf   : >> { %647 = vadd.xlane.f32.xlu1 %v646_v45  ;;  %v720_v45 = vsel %vm210_vm0, %v710_v33, 0.0  ;;  %v1088_v33 = vadd.s32 4294967272, %v2452_v61 }
  0xe0   : >> { %v978_v57 = vsel %vm977_vm6, %v962_v54, %v976_v47  ;;  %644 = vadd.xlane.f32.xlu0 %v643_v49  ;;  %v262_v60 = vpop.xlane.xlu1 %261  ;;  %v2581_v49 = vsub.s32 %v1039_v37, %v2454_v62 }
  0xe1   : >> { %v2532_v59 = vsel %vm979_vm7, %v966_v53, %v978_v57  ;;  %v259_v63 = vpop.xlane.xlu0 %258  ;;  %v998_v12 = vrot.slane %v262_v60, %v2520_v55  ;;  %v766_v53 = vsel %vm210_vm0, %v756_v40, 0.0  ;;  %v763_v57 = vsel %vm210_vm0, %v755_v46, 0.0  ;;  %v840_v46 = vld [vmem:[%s2629_s22 + $0x10] sm:$0xff] }
  0xe2   : >> { %v994_v13 = vrot.slane %v259_v63, %v2520_v55  ;;  %v712_v60 = vmul.f32 %v704_v51, %v2178_v3  ;;  %v794_v63 = vld [vmem:[%s2586_s13 + $0x10] sm:$0xff] }
  0xe3   : >> { %675 = vadd.xlane.f32.xlu1 %v674_v8 }
  0xe4   : >> { %v1023_v15 = vsel %vm967_vm1, %v998_v12, %v994_v13  ;;  %672 = vadd.xlane.f32.xlu0 %v671_v9  ;;  %v268_v17 = vpop.xlane.xlu1 %267  ;;  %v802_v13 = vmul.f32 %v794_v63, %v2174_v1  ;;  %v661_v63 = vld [vmem:[%s2485_s30 + $0x60] sm:$0xff] }
  0xe5   : >> { %v265_v18 = vpop.xlane.xlu0 %264  ;;  %v1006_v22 = vrot.slane %v268_v17, %v2520_v55  ;;  %v801_v17 = vmul.f32 %v793_v11, %v2172_v0 }
  0xe6   : >> { %v1002_v23 = vrot.slane %v265_v18, %v2520_v55 }
  0xe7   : >> { %681 = vadd.xlane.f32.xlu1 %v680_v19 }
  0xe8   : >> { %v1024_v26 = vsel %vm969_vm2, %v1002_v23, %v1023_v15  ;;  %678 = vadd.xlane.f32.xlu0 %v677_v20  ;;  %v274_v28 = vpop.xlane.xlu1 %273  ;;  %v705_v20 = vld [vmem:[%s2524_s15 + $0x40] sm:$0xff]  ;;  %v812_v23 = vsel %vm210_vm0, %v802_v13, 0.0 }
  0xe9   : >> { %v1025_v29 = vsel %vm971_vm3, %v1006_v22, %v1024_v26  ;;  %v271_v30 = vpop.xlane.xlu0 %270  ;;  %v1014_v35 = vrot.slane %v274_v28, %v2520_v55  ;;  %v713_v28 = vmul.f32 %v705_v20, %v2180_v4 }
  0xea   : >> { %v1010_v36 = vrot.slane %v271_v30, %v2520_v55  ;;  %v795_v30 = vld [vmem:[%s2586_s13 + $0x20] sm:$0xff] }
  0xeb   : >> { %718 = vadd.xlane.f32.xlu1 %v717_v27  ;;  %v809_v27 = vsel %vm210_vm0, %v801_v17, 0.0  ;;  %v729_v40 = vsel %vm210_vm0, %v713_v28, 0.0  ;;  %v751_v17 = vld [vmem:[%s2554_s0 + $0x40] sm:$0xff] }
  0xec   : >> { %v1026_v39 = vsel %vm973_vm4, %v1010_v36, %v1025_v29  ;;  %684 = vadd.xlane.f32.xlu0 %v683_v31  ;;  %v280_v41 = vpop.xlane.xlu1 %279  ;;  %v668_v29 = vmul.f32 %v660_v21, %v2182_v5  ;;  %v803_v36 = vmul.f32 %v795_v30, %v2176_v2  ;;  %v841_v30 = vld [vmem:[%s2629_s22 + $0x20] sm:$0xff] }
  0xed   : >> { %v1027_v42 = vsel %vm975_vm5, %v1014_v35, %v1026_v39  ;;  %v277_v43 = vpop.xlane.xlu0 %276  ;;  %v1022_v47 = vrot.slane %v280_v41, %v2520_v55 }
  0xee   : >> { %v1018_v48 = vrot.slane %v277_v43, %v2520_v55  ;;  %v686_v41 = vsel %vm210_vm0, %v668_v29, 0.0  ;;  %v815_v50 = vsel %vm210_vm0, %v803_v36, 0.0  ;;  %v1137_v29 = vadd.s32 4294967264, %v2452_v61 }
  0xef   : >> { %724 = vadd.xlane.f32.xlu1 %v723_v44 }
  0xf0   : >> { %v1028_v52 = vsel %vm977_vm6, %v1018_v48, %v1027_v42  ;;  %721 = vadd.xlane.f32.xlu0 %v720_v45  ;;  %v308_v55 = vpop.xlane.xlu1 %307  ;;  %v758_v42 = vmul.f32 %v750_v34, %v2178_v3  ;;  %v2642_v45 = vsub.s32 %v1088_v33, %v2454_v62 }
  0xf1   : >> { %v1029_v54 = vsel %vm979_vm7, %v1022_v47, %v1028_v52  ;;  %v305_v56 = vpop.xlane.xlu0 %304  ;;  %v1047_v9 = vrot.slane %v308_v55, %v2581_v49  ;;  %v839_v47 = vld [vmem:[%s2629_s22] sm:$0xff] }
  0xf2   : >> { %v2598_v8 = vsel %vm1717_vm8, %v2532_v59, %v1029_v54  ;;  %v1043_v10 = vrot.slane %v305_v56, %v2581_v49  ;;  %v726_v59 = vsel %vm210_vm0, %v712_v60, 0.0  ;;  %v848_v54 = vmul.f32 %v840_v46, %v2174_v1  ;;  %v706_v56 = vld [vmem:[%s2524_s15 + $0x50] sm:$0xff] }
  0xf3   : >> { %767 = vadd.xlane.f32.xlu1 %v766_v53  ;;  %v847_v55 = vmul.f32 %v839_v47, %v2172_v0  ;;  %vm1736_vm8 = vcmask 719872  }
  0xf4   : >> { %v1072_v12 = vsel %vm967_vm1, %v1047_v9, %v1043_v10  ;;  %764 = vadd.xlane.f32.xlu0 %v763_v57  ;;  %v314_v14 = vpop.xlane.xlu1 %313  ;;  %v714_v10 = vmul.f32 %v706_v56, %v2182_v5  ;;  %v858_v13 = vsel %vm210_vm0, %v848_v54, 0.0  ;;  %v707_v56 = vld [vmem:[%s2524_s15 + $0x60] sm:$0xff] }
  0xf5   : >> { %v311_v15 = vpop.xlane.xlu0 %310  ;;  %v1055_v18 = vrot.slane %v314_v14, %v2581_v49  ;;  %v669_v14 = vmul.f32 %v661_v63, %v2184_v6 }
  0xf6   : >> { %v1051_v19 = vrot.slane %v311_v15, %v2581_v49 }
  0xf7   : >> { %770 = vadd.xlane.f32.xlu1 %v769_v16 }
  0xf8   : >> { %v1073_v22 = vsel %vm969_vm2, %v1051_v19, %v1072_v12  ;;  %727 = vadd.xlane.f32.xlu0 %v726_v59  ;;  %v320_v24 = vpop.xlane.xlu1 %319  ;;  %v796_v59 = vld [vmem:[%s2586_s13 + $0x30] sm:$0xff]  ;;  %v732_v19 = vsel %vm210_vm0, %v714_v10, 0.0 }
  0xf9   : >> { %v1074_v25 = vsel %vm971_vm3, %v1055_v18, %v1073_v22  ;;  %v317_v26 = vpop.xlane.xlu0 %316  ;;  %v1063_v31 = vrot.slane %v320_v24, %v2581_v49  ;;  %v804_v24 = vmul.f32 %v796_v59, %v2178_v3 }
  0xfa   : >> { %v1059_v32 = vrot.slane %v317_v26, %v2581_v49  ;;  %v885_v26 = vld [vmem:[%s2670_s12] sm:$0xff] }
  0xfb   : >> { %813 = vadd.xlane.f32.xlu1 %v812_v23  ;;  %v689_v23 = vsel %vm210_vm0, %v669_v14, 0.0  ;;  %v818_v36 = vsel %vm210_vm0, %v804_v24, 0.0  ;;  %v797_v14 = vld [vmem:[%s2586_s13 + $0x40] sm:$0xff] }
  0xfc   : >> { %v1075_v35 = vsel %vm973_vm4, %v1059_v32, %v1074_v25  ;;  %810 = vadd.xlane.f32.xlu0 %v809_v27  ;;  %v326_v37 = vpop.xlane.xlu1 %325  ;;  %v759_v25 = vmul.f32 %v751_v17, %v2180_v4  ;;  %v893_v32 = vmul.f32 %v885_v26, %v2172_v0  ;;  %v887_v26 = vld [vmem:[%s2670_s12 + $0x20] sm:$0xff] }
  0xfd   : >> { %v1076_v38 = vsel %vm975_vm5, %v1063_v31, %v1075_v35  ;;  %v323_v39 = vpop.xlane.xlu0 %322  ;;  %v1071_v43 = vrot.slane %v326_v37, %v2581_v49 }
  0xfe   : >> { %v1067_v44 = vrot.slane %v323_v39, %v2581_v49  ;;  %v772_v49 = vsel %vm210_vm0, %v758_v42, 0.0  ;;  %v775_v37 = vsel %vm210_vm0, %v759_v25, 0.0  ;;  %v662_v42 = vld [vmem:[%s2485_s30 + $0x70] sm:$0xff]  ;;  %v901_v46 = vsel %vm210_vm0, %v893_v32, 0.0  ;;  %s1916_s30 = sshll.u32 %s2071_s21, 3  ;;  %s187_s21 = sadd.s32 1, %s2071_s21  }
  0xff   : >> { %730 = vadd.xlane.f32.xlu1 %v729_v40  ;;  %v1186_v25 = vadd.s32 4294967256, %v2452_v61  ;;  %p184_p7 = scmp.ge.s32.totalorder %s187_s21, 6  }
 0x100   : >> { %v1077_v48 = vsel %vm977_vm6, %v1067_v44, %v1076_v38  ;;  %687 = vadd.xlane.f32.xlu0 %v686_v41  ;;  %v354_v52 = vpop.xlane.xlu1 %353  ;;  %v849_v38 = vmul.f32 %v841_v30, %v2176_v2  ;;  %v2692_v41 = vsub.s32 %v1137_v29, %v2454_v62  ;;  %s2975_s21 = scalar_lea.sflag (%p184_p7), [#allocation6], %s161_s9 }
 0x101   : >> { %v1078_v51 = vsel %vm979_vm7, %v1071_v43, %v1077_v48  ;;  %v351_v53 = vpop.xlane.xlu0 %350  ;;  %v1096_v58 = vrot.slane %v354_v52, %v2642_v45  ;;  %v886_v43 = vld [vmem:[%s2670_s12 + $0x10] sm:$0xff] }
 0x102   : >> { %v1719_v57 = vsel %vm210_vm0, %v2598_v8, %v1078_v51  ;;  %v1092_v60 = vrot.slane %v351_v53, %v2642_v45  ;;  %v855_v8 = vsel %vm210_vm0, %v847_v55, 0.0  ;;  %v861_v51 = vsel %vm210_vm0, %v849_v38, 0.0  ;;  %v752_v53 = vld [vmem:[%s2554_s0 + $0x50] sm:$0xff] }
 0x103   : >> { %816 = vadd.xlane.f32.xlu1 %v815_v50  ;;  %v894_v52 = vmul.f32 %v886_v43, %v2174_v1  ;;  %v798_v38 = vld [vmem:[%s2586_s13 + $0x50] sm:$0xff] }
 0x104   : >> { %v1121_v9 = vsel %vm967_vm1, %v1096_v58, %v1092_v60  ;;  %773 = vadd.xlane.f32.xlu0 %v772_v49  ;;  %v360_v11 = vpop.xlane.xlu1 %359  ;;  %v760_v60 = vmul.f32 %v752_v53, %v2182_v5  ;;  %v843_v53 = vld [vmem:[%s2629_s22 + $0x40] sm:$0xff] }
 0x105   : >> { %v357_v12 = vpop.xlane.xlu0 %356  ;;  %v1104_v15 = vrot.slane %v360_v11, %v2642_v45  ;;  %v904_v11 = vsel %vm210_vm0, %v894_v52, 0.0 }
 0x106   : >> { %v1100_v16 = vrot.slane %v357_v12, %v2642_v45 }
 0x107   : >> { %859 = vadd.xlane.f32.xlu1 %v858_v13 }
 0x108   : >> { %v1122_v18 = vsel %vm969_vm2, %v1100_v16, %v1121_v9  ;;  %856 = vadd.xlane.f32.xlu0 %v855_v8  ;;  %v366_v20 = vpop.xlane.xlu1 %365  ;;  %v842_v8 = vld [vmem:[%s2629_s22 + $0x30] sm:$0xff]  ;;  %v778_v16 = vsel %vm210_vm0, %v760_v60, 0.0 }
 0x109   : >> { %v1123_v21 = vsel %vm971_vm3, %v1104_v15, %v1122_v18  ;;  %v363_v22 = vpop.xlane.xlu0 %362  ;;  %v1112_v27 = vrot.slane %v366_v20, %v2642_v45  ;;  %v850_v20 = vmul.f32 %v842_v8, %v2178_v3 }
 0x10a   : >> { %v1108_v28 = vrot.slane %v363_v22, %v2642_v45  ;;  %v708_v22 = vld [vmem:[%s2524_s15 + $0x70] sm:$0xff]  ;;  %s1747_s15 = scalar_lea.vmem %s163_s20, %s1916_s30 [#allocation5] }
 0x10b   : >> { %733 = vadd.xlane.f32.xlu1 %v732_v19  ;;  %v864_v32 = vsel %vm210_vm0, %v850_v20, 0.0 }
 0x10c   : >> { %v1124_v31 = vsel %vm973_vm4, %v1108_v28, %v1123_v21  ;;  %690 = vadd.xlane.f32.xlu0 %v689_v23  ;;  %v372_v33 = vpop.xlane.xlu1 %371  ;;  %v805_v21 = vmul.f32 %v797_v14, %v2180_v4  ;;  %v716_v28 = vmul.f32 %v708_v22, %v2186_v7  ;;  %v844_v22 = vld [vmem:[%s2629_s22 + $0x50] sm:$0xff] }
 0x10d   : >> { %v1125_v34 = vsel %vm975_vm5, %v1112_v27, %v1124_v31  ;;  %v369_v35 = vpop.xlane.xlu0 %368  ;;  %v1120_v39 = vrot.slane %v372_v33, %v2642_v45 }
 0x10e   : >> { %v1116_v40 = vrot.slane %v369_v35, %v2642_v45  ;;  %v670_v45 = vmul.f32 %v662_v42, %v2186_v7  ;;  %v821_v33 = vsel %vm210_vm0, %v805_v21, 0.0  ;;  %v738_v42 = vsel %vm210_vm0, %v716_v28, 0.0 }
 0x10f   : >> { %819 = vadd.xlane.f32.xlu1 %v818_v36  ;;  %v1235_v21 = vadd.s32 4294967248, %v2452_v61 }
 0x110   : >> { %v1126_v44 = vsel %vm977_vm6, %v1116_v40, %v1125_v34  ;;  %776 = vadd.xlane.f32.xlu0 %v775_v37  ;;  %v400_v48 = vpop.xlane.xlu1 %399  ;;  %v692_v10 = vsel %vm210_vm0, %v670_v45, 0.0  ;;  %v895_v34 = vmul.f32 %v887_v26, %v2176_v2  ;;  %v2735_v37 = vsub.s32 %v1186_v25, %v2454_v62 }
 0x111   : >> { %v1127_v47 = vsel %vm979_vm7, %v1120_v39, %v1126_v44  ;;  %v397_v50 = vpop.xlane.xlu0 %396  ;;  %v1145_v54 = vrot.slane %v400_v48, %v2692_v41  ;;  %v753_v39 = vld [vmem:[%s2554_s0 + $0x60] sm:$0xff] }
 0x112   : >> { %v1721_v49 = vsel %vm1720_vm9, %v1719_v57, %v1127_v47  ;;  %v1141_v55 = vrot.slane %v397_v50, %v2692_v41  ;;  %v715_v57 = vmul.f32 %v707_v56, %v2184_v6  ;;  %v907_v47 = vsel %vm210_vm0, %v895_v34, 0.0  ;;  %v888_v50 = vld [vmem:[%s2670_s12 + $0x30] sm:$0xff]  ;;  %v845_v34 = vld [vmem:[%s2629_s22 + $0x60] sm:$0xff] }
 0x113   : >> { %902 = vadd.xlane.f32.xlu1 %v901_v46  ;;  %v761_v48 = vmul.f32 %v753_v39, %v2184_v6  ;;  %vm1738_vm9 = vcmask 785408  }
 0x114   : >> { %v1170_v58 = vsel %vm967_vm1, %v1145_v54, %v1141_v55  ;;  %862 = vadd.xlane.f32.xlu0 %v861_v51  ;;  %v406_v63 = vpop.xlane.xlu1 %405  ;;  %v735_v19 = vsel %vm210_vm0, %v715_v57, 0.0  ;;  %v896_v55 = vmul.f32 %v888_v50, %v2178_v3  ;;  %v754_v57 = vld [vmem:[%s2554_s0 + $0x70] sm:$0xff]  ;;  %s1923_s0 = smul.u32 (%p184_p7), 768, %s2130_s27  ;;  %s2075_s27 = smov (%p184_p7), [#allocation5]  }
 0x115   : >> { %v403_v9 = vpop.xlane.xlu0 %402  ;;  %v1153_v12 = vrot.slane %v406_v63, %v2692_v41  ;;  %v781_v63 = vsel %vm210_vm0, %v761_v48, 0.0  ;;  %v890_v50 = vld [vmem:[%s2670_s12 + $0x50] sm:$0xff]  ;;  %s2003_s10 = sshll.u32 (%p184_p7), %s2075_s27, 4  ;;  %s2004_s10 = int_to_ptr.vmem [resolvable:$false] %s2003_s10 }
 0x116   : >> { %v1149_v13 = vrot.slane %v403_v9, %v2692_v41  ;;  %s2969_s17 = scalar_lea.hbm (%p184_p7), %s3019_s4, %s1923_s0 }
 0x117   : >> { %693 = vadd.xlane.f32.xlu1 %v692_v10 }
 0x118   : >> { %v1171_v15 = vsel %vm969_vm2, %v1149_v13, %v1170_v58  ;;  %905 = vadd.xlane.f32.xlu0 %v904_v11  ;;  %v412_v59 = vpop.xlane.xlu1 %411  ;;  %v799_v11 = vld [vmem:[%s2586_s13 + $0x60] sm:$0xff]  ;;  %v910_v13 = vsel %vm210_vm0, %v896_v55, 0.0 }
 0x119   : >> { %v1172_v17 = vsel %vm971_vm3, %v1153_v12, %v1171_v15  ;;  %v409_v18 = vpop.xlane.xlu0 %408  ;;  %v1161_v23 = vrot.slane %v412_v59, %v2692_v41  ;;  %v807_v59 = vmul.f32 %v799_v11, %v2184_v6 }
 0x11a   : >> { %v1157_v24 = vrot.slane %v409_v18, %v2692_v41  ;;  %v889_v18 = vld [vmem:[%s2670_s12 + $0x40] sm:$0xff] }
 0x11b   : >> { %779 = vadd.xlane.f32.xlu1 %v778_v16  ;;  %v827_v28 = vsel %vm210_vm0, %v807_v59, 0.0  ;;  %v1284_v59 = vadd.s32 4294967240, %v2452_v61 }
 0x11c   : >> { %v1173_v27 = vsel %vm973_vm4, %v1157_v24, %v1172_v17  ;;  %736 = vadd.xlane.f32.xlu0 %v735_v19  ;;  %v418_v29 = vpop.xlane.xlu1 %417  ;;  %v762_v17 = vmul.f32 %v754_v57, %v2186_v7  ;;  %v897_v24 = vmul.f32 %v889_v18, %v2180_v4 }
 0x11d   : >> { %v1174_v30 = vsel %vm975_vm5, %v1161_v23, %v1173_v27  ;;  %v415_v31 = vpop.xlane.xlu0 %414  ;;  %v1169_v35 = vrot.slane %v418_v29, %v2692_v41 }
 0x11e   : >> { %v1165_v36 = vrot.slane %v415_v31, %v2692_v41  ;;  %v806_v41 = vmul.f32 %v798_v38, %v2182_v5  ;;  %v784_v29 = vsel %vm210_vm0, %v762_v17, 0.0  ;;  %v913_v38 = vsel %vm210_vm0, %v897_v24, 0.0 }
 0x11f   : >> { %865 = vadd.xlane.f32.xlu1 %v864_v32 }
 0x120   : >> { %v1175_v40 = vsel %vm977_vm6, %v1165_v36, %v1174_v30  ;;  %822 = vadd.xlane.f32.xlu0 %v821_v33  ;;  %v446_v44 = vpop.xlane.xlu1 %445  ;;  %v824_v60 = vsel %vm210_vm0, %v806_v41, 0.0  ;;  %v852_v30 = vmul.f32 %v844_v22, %v2182_v5  ;;  %v1238_v33 = vsub.s32 %v1235_v21, %v2454_v62 }
 0x121   : >> { %v1176_v43 = vsel %vm979_vm7, %v1169_v35, %v1175_v40  ;;  %v443_v46 = vpop.xlane.xlu0 %442  ;;  %v1194_v45 = vrot.slane %v446_v44, %v2735_v37  ;;  %v800_v35 = vld [vmem:[%s2586_s13 + $0x70] sm:$0xff]  ;;  %s1763_s13 = sshll.u32 (%p184_p7), %s163_s20, 4  ;;  %s2005_s20 = scalar_lea.vmem (%p184_p7), %s2004_s10, 1536  ;;  %s2971_s13 = int_to_ptr.vmem [resolvable:$true] %s1763_s13 }
 0x122   : >> { %v1723_v51 = vsel %vm1722_vm10, %v1721_v49, %v1176_v43  ;;  %v1190_v52 = vrot.slane %v443_v46, %v2735_v37  ;;  %v851_v49 = vmul.f32 %v843_v53, %v2180_v4  ;;  %v870_v43 = vsel %vm210_vm0, %v852_v30, 0.0  ;;  %v846_v46 = vld [vmem:[%s2629_s22 + $0x70] sm:$0xff]  ;;  %s1999_s19 = scalar_lea.vmem (%p184_p7), %s2971_s13, 768  ;;  %p2006_p11 = scmp.lt.s32.totalorder (%p184_p7), %s2971_s13, %s2004_s10 }
 0x123   : >> { %739 = vadd.xlane.f32.xlu1 %v738_v42  ;;  %v808_v44 = vmul.f32 %v800_v35, %v2186_v7  ;;  %vm1740_vm10 = vcmask 850944   ;;  %p2000_p8 = scmp.ne.s32.totalorder (%p184_p7), %s2971_s13, %s1999_s19  ;;  %p2007_p12 = scmp.lt.s32.totalorder (%p184_p7), %s2005_s20, %s1999_s19 }
 0x124   : >> { %v1219_v54 = vsel %vm967_vm1, %v1194_v45, %v1190_v52  ;;  %908 = vadd.xlane.f32.xlu0 %v907_v47  ;;  %v452_v56 = vpop.xlane.xlu1 %451  ;;  %v867_v16 = vsel %vm210_vm0, %v851_v49, 0.0  ;;  %v854_v52 = vmul.f32 %v846_v46, %v2186_v7  ;;  %v892_v49 = vld [vmem:[%s2670_s12 + $0x70] sm:$0xff]  ;;  %v1333_v46 = vadd.s32 4294967232, %v2452_v61 }
 0x125   : >> { %v449_v58 = vpop.xlane.xlu0 %448  ;;  %v1202_v9 = vrot.slane %v452_v56, %v2735_v37  ;;  %v830_v56 = vsel %vm210_vm0, %v808_v44, 0.0  ;;  %p2001_p9 = pnand (%p184_p7), %p2000_p8, %p2147_p1  ;;  %p2008_p13 = por (%p184_p7), %p2007_p12, %p2006_p11 }
 0x126   : >> { %v1198_v10 = vrot.slane %v449_v58, %v2735_v37  ;;  %v898_v58 = vmul.f32 %v890_v50, %v2182_v5 }
 0x127   : >> { %825 = vadd.xlane.f32.xlu1 %v824_v60  ;;  %p2002_p10 = pneg (%p184_p7), %p2001_p9 }
 0x128   : >> { %v1220_v12 = vsel %vm969_vm2, %v1198_v10, %v1219_v54  ;;  %782 = vadd.xlane.f32.xlu0 %v781_v63  ;;  %v458_v8 = vpop.xlane.xlu1 %457  ;;  %v891_v63 = vld [vmem:[%s2670_s12 + $0x60] sm:$0xff]  ;;  %v876_v10 = vsel %vm210_vm0, %v854_v52, 0.0 }
 0x129   : >> { %v1221_v14 = vsel %vm971_vm3, %v1202_v9, %v1220_v12  ;;  %v455_v15 = vpop.xlane.xlu0 %454  ;;  %v1210_v19 = vrot.slane %v458_v8, %v2735_v37  ;;  %v899_v8 = vmul.f32 %v891_v63, %v2184_v6  ;;  %p2009_p0 = pnand (%p184_p7), %p2008_p13, %p2002_p10 }
 0x12a   : >> { %v1206_v20 = vrot.slane %v455_v15, %v2735_v37 }
 0x12b   : >> { %911 = vadd.xlane.f32.xlu1 %v910_v13  ;;  %v916_v13 = vsel %vm210_vm0, %v898_v58, 0.0  ;;  %v919_v21 = vsel %vm210_vm0, %v899_v8, 0.0 }
 0x12c   : >> { %v1222_v23 = vsel %vm973_vm4, %v1206_v20, %v1221_v14  ;;  %868 = vadd.xlane.f32.xlu0 %v867_v16  ;;  %v464_v25 = vpop.xlane.xlu1 %463  ;;  %v900_v14 = vmul.f32 %v892_v49, %v2186_v7 }
 0x12d   : >> { %v1223_v26 = vsel %vm975_vm5, %v1210_v19, %v1222_v23  ;;  %v461_v27 = vpop.xlane.xlu0 %460  ;;  %v1218_v31 = vrot.slane %v464_v25, %v2735_v37  ;;  %v1287_v25 = vsub.s32 %v1284_v59, %v2454_v62  ;;  %v1382_v59 = vadd.s32 4294967224, %v2452_v61 }
 0x12e   : >> { %v1214_v32 = vrot.slane %v461_v27, %v2735_v37  ;;  %v853_v37 = vmul.f32 %v845_v34, %v2184_v6  ;;  %v922_v22 = vsel %vm210_vm0, %v900_v14, 0.0 }
 0x12f   : >> { %828 = vadd.xlane.f32.xlu1 %v827_v28 }
 0x130   : >> { %v1224_v36 = vsel %vm977_vm6, %v1214_v32, %v1223_v26  ;;  %785 = vadd.xlane.f32.xlu0 %v784_v29  ;;  %v492_v40 = vpop.xlane.xlu1 %491  ;;  %v873_v55 = vsel %vm210_vm0, %v853_v37, 0.0  ;;  %vm1734_vm0 = vcmask 654336  }
 0x131   : >> { %v1225_v39 = vsel %vm979_vm7, %v1218_v31, %v1224_v36  ;;  %v489_v42 = vpop.xlane.xlu0 %488  ;;  %v1243_v41 = vrot.slane %v492_v40, %v1238_v33 }
 0x132   : >> { %v1725_v47 = vsel %vm1724_vm11, %v1723_v51, %v1225_v39  ;;  %v1239_v48 = vrot.slane %v489_v42, %v1238_v33 }
 0x133   : >> { %914 = vadd.xlane.f32.xlu1 %v913_v38 }
 0x134   : >> { %v1268_v45 = vsel %vm967_vm1, %v1243_v41, %v1239_v48  ;;  %871 = vadd.xlane.f32.xlu0 %v870_v43  ;;  %v498_v53 = vpop.xlane.xlu1 %497 }
 0x135   : >> { %v495_v54 = vpop.xlane.xlu0 %494  ;;  %v1251_v60 = vrot.slane %v498_v53, %v1238_v33  ;;  %v1336_v53 = vsub.s32 %v1333_v46, %v2454_v62 }
 0x136   : >> { %v1247_v51 = vrot.slane %v495_v54, %v1238_v33 }
 0x137   : >> { %874 = vadd.xlane.f32.xlu1 %v873_v55 }
 0x138   : >> { %v1269_v9 = vsel %vm969_vm2, %v1247_v51, %v1268_v45  ;;  %831 = vadd.xlane.f32.xlu0 %v830_v56  ;;  %v504_v11 = vpop.xlane.xlu1 %503 }
 0x139   : >> { %v1270_v57 = vsel %vm971_vm3, %v1251_v60, %v1269_v9  ;;  %v501_v12 = vpop.xlane.xlu0 %500  ;;  %v1259_v15 = vrot.slane %v504_v11, %v1238_v33 }
 0x13a   : >> { %v1255_v16 = vrot.slane %v501_v12, %v1238_v33 }
 0x13b   : >> { %877 = vadd.xlane.f32.xlu1 %v876_v10 }
 0x13c   : >> { %v1271_v17 = vsel %vm973_vm4, %v1255_v16, %v1270_v57  ;;  %917 = vadd.xlane.f32.xlu0 %v916_v13  ;;  %v510_v18 = vpop.xlane.xlu1 %509 }
 0x13d   : >> { %v1272_v19 = vsel %vm975_vm5, %v1259_v15, %v1271_v17  ;;  %v507_v20 = vpop.xlane.xlu0 %506  ;;  %v1267_v23 = vrot.slane %v510_v18, %v1238_v33 }
 0x13e   : >> { %v1263_v24 = vrot.slane %v507_v20, %v1238_v33 }
 0x13f   : >> { %923 = vadd.xlane.f32.xlu1 %v922_v22 }
 0x140   : >> { %v1273_v26 = vsel %vm977_vm6, %v1263_v24, %v1272_v19  ;;  %920 = vadd.xlane.f32.xlu0 %v919_v21  ;;  %v538_v28 = vpop.xlane.xlu1 %537 }
 0x141   : >> { %v1274_v27 = vsel %vm979_vm7, %v1267_v23, %v1273_v26  ;;  %v535_v29 = vpop.xlane.xlu0 %534  ;;  %v1292_v31 = vrot.slane %v538_v28, %v1287_v25  ;;  %v1385_v23 = vsub.s32 %v1382_v59, %v2454_v62 }
 0x142   : >> { %v1727_v30 = vsel %vm1726_vm12, %v1725_v47, %v1274_v27  ;;  %v1288_v32 = vrot.slane %v535_v29, %v1287_v25 }
 0x144   : >> { %v1317_v34 = vsel %vm967_vm1, %v1292_v31, %v1288_v32  ;;  %v544_v35 = vpop.xlane.xlu1 %543 }
 0x145   : >> { %v541_v36 = vpop.xlane.xlu0 %540  ;;  %v1300_v38 = vrot.slane %v544_v35, %v1287_v25 }
 0x146   : >> { %v1296_v33 = vrot.slane %v541_v36, %v1287_v25 }
 0x148   : >> { %v1318_v39 = vsel %vm969_vm2, %v1296_v33, %v1317_v34  ;;  %v550_v40 = vpop.xlane.xlu1 %549 }
 0x149   : >> { %v1319_v42 = vsel %vm971_vm3, %v1300_v38, %v1318_v39  ;;  %v547_v43 = vpop.xlane.xlu0 %546  ;;  %v1308_v37 = vrot.slane %v550_v40, %v1287_v25 }
 0x14a   : >> { %v1304_v44 = vrot.slane %v547_v43, %v1287_v25 }
 0x14c   : >> { %v1320_v47 = vsel %vm973_vm4, %v1304_v44, %v1319_v42  ;;  %v556_v41 = vpop.xlane.xlu1 %555 }
 0x14d   : >> { %v1321_v48 = vsel %vm975_vm5, %v1308_v37, %v1320_v47  ;;  %v553_v50 = vpop.xlane.xlu0 %552  ;;  %v1316_v45 = vrot.slane %v556_v41, %v1287_v25  ;;  %v1431_v37 = vadd.s32 4294967216, %v2452_v61 }
 0x14e   : >> { %v1312_v52 = vrot.slane %v553_v50, %v1287_v25 }
 0x150   : >> { %v1322_v54 = vsel %vm977_vm6, %v1312_v52, %v1321_v48  ;;  %v584_v56 = vpop.xlane.xlu1 %583 }
 0x151   : >> { %v1323_v55 = vsel %vm979_vm7, %v1316_v45, %v1322_v54  ;;  %v581_v58 = vpop.xlane.xlu0 %580  ;;  %v1341_v51 = vrot.slane %v584_v56, %v1336_v53  ;;  %v2834_v45 = vsub.s32 %v1431_v37, %v2454_v62 }
 0x152   : >> { %v1729_v60 = vsel %vm1728_vm13, %v1727_v30, %v1323_v55  ;;  %v1337_v63 = vrot.slane %v581_v58, %v1336_v53 }
 0x154   : >> { %v1366_v49 = vsel %vm967_vm1, %v1341_v51, %v1337_v63  ;;  %v590_v9 = vpop.xlane.xlu1 %589 }
 0x155   : >> { %v587_v10 = vpop.xlane.xlu0 %586  ;;  %v1349_v11 = vrot.slane %v590_v9, %v1336_v53 }
 0x156   : >> { %v1345_v57 = vrot.slane %v587_v10, %v1336_v53 }
 0x158   : >> { %v1367_v12 = vsel %vm969_vm2, %v1345_v57, %v1366_v49  ;;  %v596_v13 = vpop.xlane.xlu1 %595 }
 0x159   : >> { %v1368_v8 = vsel %vm971_vm3, %v1349_v11, %v1367_v12  ;;  %v593_v14 = vpop.xlane.xlu0 %592  ;;  %v1357_v15 = vrot.slane %v596_v13, %v1336_v53  ;;  %v1480_v11 = vadd.s32 4294967208, %v2452_v61 }
 0x15a   : >> { %v1353_v16 = vrot.slane %v593_v14, %v1336_v53 }
 0x15b   : >> { %v2847_v14 = vsub.s32 %v1480_v11, %v2454_v62 }
 0x15c   : >> { %v1369_v17 = vsel %vm973_vm4, %v1353_v16, %v1368_v8  ;;  %v602_v18 = vpop.xlane.xlu1 %601  ;;  %v1529_v16 = vadd.s32 4294967200, %v2452_v61 }
 0x15d   : >> { %v1370_v19 = vsel %vm975_vm5, %v1357_v15, %v1369_v17  ;;  %v599_v20 = vpop.xlane.xlu0 %598  ;;  %v1365_v21 = vrot.slane %v602_v18, %v1336_v53 }
 0x15e   : >> { %v1361_v22 = vrot.slane %v599_v20, %v1336_v53 }
 0x160   : >> { %v1371_v24 = vsel %vm977_vm6, %v1361_v22, %v1370_v19  ;;  %v630_v26 = vpop.xlane.xlu1 %629  ;;  %v2856_v22 = vsub.s32 %v1529_v16, %v2454_v62 }
 0x161   : >> { %v1372_v25 = vsel %vm979_vm7, %v1365_v21, %v1371_v24  ;;  %v627_v27 = vpop.xlane.xlu0 %626  ;;  %v1390_v29 = vrot.slane %v630_v26, %v1385_v23 }
 0x162   : >> { %v1731_v28 = vsel %vm1730_vm14, %v1729_v60, %v1372_v25  ;;  %v1386_v30 = vrot.slane %v627_v27, %v1385_v23 }
 0x164   : >> { %v1415_v31 = vsel %vm967_vm1, %v1390_v29, %v1386_v30  ;;  %v636_v32 = vpop.xlane.xlu1 %635 }
 0x165   : >> { %v633_v34 = vpop.xlane.xlu0 %632  ;;  %v1398_v35 = vrot.slane %v636_v32, %v1385_v23 }
 0x166   : >> { %v1394_v36 = vrot.slane %v633_v34, %v1385_v23 }
 0x168   : >> { %v1416_v38 = vsel %vm969_vm2, %v1394_v36, %v1415_v31  ;;  %v642_v33 = vpop.xlane.xlu1 %641 }
 0x169   : >> { %v1417_v39 = vsel %vm971_vm3, %v1398_v35, %v1416_v38  ;;  %v639_v40 = vpop.xlane.xlu0 %638  ;;  %v1406_v42 = vrot.slane %v642_v33, %v1385_v23 }
 0x16a   : >> { %v1402_v43 = vrot.slane %v639_v40, %v1385_v23 }
 0x16c   : >> { %v1418_v44 = vsel %vm973_vm4, %v1402_v43, %v1417_v39  ;;  %v648_v46 = vpop.xlane.xlu1 %647 }
 0x16d   : >> { %v1419_v47 = vsel %vm975_vm5, %v1406_v42, %v1418_v44  ;;  %v645_v41 = vpop.xlane.xlu0 %644  ;;  %v1414_v48 = vrot.slane %v648_v46, %v1385_v23 }
 0x16e   : >> { %v1410_v50 = vrot.slane %v645_v41, %v1385_v23 }
 0x170   : >> { %v1420_v52 = vsel %vm977_vm6, %v1410_v50, %v1419_v47  ;;  %v676_v54 = vpop.xlane.xlu1 %675 }
 0x171   : >> { %v1421_v53 = vsel %vm979_vm7, %v1414_v48, %v1420_v52  ;;  %v673_v55 = vpop.xlane.xlu0 %672  ;;  %v1439_v56 = vrot.slane %v676_v54, %v2834_v45 }
 0x172   : >> { %v1435_v58 = vrot.slane %v673_v55, %v2834_v45  ;;  %v1733_v60 = vsel %vm1732_vm15, %v1731_v28, %v1421_v53 }
 0x174   : >> { %v1464_v51 = vsel %vm967_vm1, %v1439_v56, %v1435_v58  ;;  %v682_v63 = vpop.xlane.xlu1 %681 }
 0x175   : >> { %v679_v49 = vpop.xlane.xlu0 %678  ;;  %v1447_v9 = vrot.slane %v682_v63, %v2834_v45 }
 0x176   : >> { %v1443_v10 = vrot.slane %v679_v49, %v2834_v45 }
 0x178   : >> { %v1465_v57 = vsel %vm969_vm2, %v1443_v10, %v1464_v51  ;;  %v719_v12 = vpop.xlane.xlu1 %718 }
 0x179   : >> { %v1466_v13 = vsel %vm971_vm3, %v1447_v9, %v1465_v57  ;;  %v685_v8 = vpop.xlane.xlu0 %684  ;;  %v1484_v19 = vrot.slane %v719_v12, %v2847_v14 }
 0x17a   : >> { %v1451_v15 = vrot.slane %v685_v8, %v2834_v45 }
 0x17c   : >> { %v1467_v59 = vsel %vm973_vm4, %v1451_v15, %v1466_v13  ;;  %v725_v17 = vpop.xlane.xlu1 %724 }
 0x17d   : >> { %v722_v18 = vpop.xlane.xlu0 %721  ;;  %v1492_v20 = vrot.slane %v725_v17, %v2847_v14 }
 0x17e   : >> { %v1488_v21 = vrot.slane %v722_v18, %v2847_v14 }
 0x180   : >> { %v1513_v23 = vsel %vm967_vm1, %v1488_v21, %v1484_v19  ;;  %v768_v24 = vpop.xlane.xlu1 %767 }
 0x181   : >> { %v765_v25 = vpop.xlane.xlu0 %764  ;;  %v1514_v26 = vsel %vm969_vm2, %v1492_v20, %v1513_v23  ;;  %v1537_v27 = vrot.slane %v768_v24, %v2856_v22 }
 0x182   : >> { %v1533_v28 = vrot.slane %v765_v25, %v2856_v22  ;;  %v1578_v25 = vadd.s32 4294967192, %v2452_v61 }
 0x184   : >> { %v1562_v29 = vsel %vm967_vm1, %v1537_v27, %v1533_v28  ;;  %v771_v30 = vpop.xlane.xlu1 %770 }
 0x185   : >> { %v728_v31 = vpop.xlane.xlu0 %727  ;;  %v1541_v32 = vrot.slane %v771_v30, %v2856_v22 }
 0x186   : >> { %v1496_v34 = vrot.slane %v728_v31, %v2847_v14 }
 0x187   : >> { %v1563_v35 = vsel %vm969_vm2, %v1541_v32, %v1562_v29  ;;  %v1627_v29 = vadd.s32 4294967184, %v2452_v61  ;;  %v1581_v32 = vsub.s32 %v1578_v25, %v2454_v62 }
 0x188   : >> { %v1515_v36 = vsel %vm971_vm3, %v1496_v34, %v1514_v26  ;;  %v2867_v38 = vpop.xlane.xlu1 %813 }
 0x189   : >> { %v2869_v33 = vpop.xlane.xlu0 %810 }
 0x18c   : >> { %v731_v39 = vpop.xlane.xlu1 %730 }
 0x18d   : >> { %v688_v40 = vpop.xlane.xlu0 %687  ;;  %v1500_v57 = vrot.slane %v731_v39, %v2847_v14 }
 0x18e   : >> { %v1455_v53 = vrot.slane %v688_v40, %v2834_v45  ;;  %v1630_v40 = vsub.s32 %v1627_v29, %v2454_v62 }
 0x18f   : >> { %v1516_v16 = vsel %vm973_vm4, %v1500_v57, %v1515_v36 }
 0x190   : >> { %v2871_v42 = vpop.xlane.xlu1 %816  ;;  %v1468_v58 = vsel %vm975_vm5, %v1455_v53, %v1467_v59 }
 0x191   : >> { %v774_v43 = vpop.xlane.xlu0 %773 }
 0x192   : >> { %v1545_v24 = vrot.slane %v774_v43, %v2856_v22 }
 0x194   : >> { %v2873_v37 = vpop.xlane.xlu1 %859  ;;  %v1564_v31 = vsel %vm971_vm3, %v1545_v24, %v1563_v35  ;;  %v1586_v35 = vrot.slane %v2867_v38, %v1581_v32 }
 0x195   : >> { %v2875_v44 = vpop.xlane.xlu0 %856 }
 0x198   : >> { %v734_v46 = vpop.xlane.xlu1 %733 }
 0x199   : >> { %v691_v47 = vpop.xlane.xlu0 %690  ;;  %v1504_v8 = vrot.slane %v734_v46, %v2847_v14 }
 0x19a   : >> { %v1459_v54 = vrot.slane %v691_v47, %v2834_v45 }
 0x19b   : >> { %v1517_v17 = vsel %vm975_vm5, %v1504_v8, %v1516_v16 }
 0x19c   : >> { %v2877_v41 = vpop.xlane.xlu1 %819  ;;  %v1469_v63 = vsel %vm977_vm6, %v1459_v54, %v1468_v58  ;;  %v1582_v54 = vrot.slane %v2869_v33, %v1581_v32 }
 0x19d   : >> { %v777_v48 = vpop.xlane.xlu0 %776 }
 0x19e   : >> { %v1549_v26 = vrot.slane %v777_v48, %v2856_v22  ;;  %v1676_v48 = vadd.s32 4294967176, %v2452_v61  ;;  %v1611_v61 = vsel %vm967_vm1, %v1586_v35, %v1582_v54 }
 0x1a0   : >> { %v2879_v50 = vpop.xlane.xlu1 %902  ;;  %v1565_v34 = vsel %vm973_vm4, %v1549_v26, %v1564_v31 }
 0x1a1   : >> { %v2881_v52 = vpop.xlane.xlu0 %862 }
 0x1a4   : >> { %v694_v55 = vpop.xlane.xlu1 %693 }
 0x1a5   : >> { %v2885_v56 = vpop.xlane.xlu0 %905  ;;  %v1463_v51 = vrot.slane %v694_v55, %v2834_v45 }
 0x1a7   : >> { %v1470_v49 = vsel %vm979_vm7, %v1463_v51, %v1469_v63  ;;  %v1590_v63 = vrot.slane %v2871_v42, %v1581_v32 }
 0x1a8   : >> { %v1735_v9 = vsel %vm1734_vm0, %v1733_v60, %v1470_v49  ;;  %v780_v10 = vpop.xlane.xlu1 %779  ;;  %v1635_v49 = vrot.slane %v2873_v37, %v1630_v40 }
 0x1a9   : >> { %v737_v11 = vpop.xlane.xlu0 %736  ;;  %v1612_v33 = vsel %vm969_vm2, %v1590_v63, %v1611_v61 }
 0x1aa   : >> { %v1508_v15 = vrot.slane %v737_v11, %v2847_v14  ;;  %v1639_v11 = vrot.slane %v2881_v52, %v1630_v40 }
 0x1ac   : >> { %v2892_v12 = vpop.xlane.xlu1 %865  ;;  %v1518_v18 = vsel %vm977_vm6, %v1508_v15, %v1517_v17 }
 0x1ad   : >> { %v2894_v13 = vpop.xlane.xlu0 %822  ;;  %v1643_v42 = vrot.slane %v2892_v12, %v1630_v40 }
 0x1ae   : >> { %v1598_v37 = vrot.slane %v2894_v13, %v1581_v32 }
 0x1b0   : >> { %v740_v45 = vpop.xlane.xlu1 %739 }
 0x1b1   : >> { %v2899_v59 = vpop.xlane.xlu0 %908  ;;  %v1512_v60 = vrot.slane %v740_v45, %v2847_v14  ;;  %v1553_v14 = vrot.slane %v780_v10, %v2856_v22  ;;  %v1679_v10 = vsub.s32 %v1676_v48, %v2454_v62 }
 0x1b3   : >> { %v1519_v19 = vsel %vm979_vm7, %v1512_v60, %v1518_v18  ;;  %v1566_v43 = vsel %vm975_vm5, %v1553_v14, %v1565_v34  ;;  %v1680_v16 = vrot.slane %v2879_v50, %v1679_v10  ;;  %v1688_v52 = vrot.slane %v2899_v59, %v1679_v10 }
 0x1b4   : >> { %v1737_v20 = vsel %vm1736_vm8, %v1735_v9, %v1519_v19  ;;  %v826_v21 = vpop.xlane.xlu1 %825  ;;  %v1631_v9 = vrot.slane %v2875_v44, %v1630_v40 }
 0x1b5   : >> { %v783_v23 = vpop.xlane.xlu0 %782  ;;  %v1602_v15 = vrot.slane %v826_v21, %v1581_v32 }
 0x1b6   : >> { %v1557_v30 = vrot.slane %v783_v23, %v2856_v22  ;;  %v1660_v8 = vsel %vm967_vm1, %v1635_v49, %v1631_v9 }
 0x1b7   : >> { %v1661_v60 = vsel %vm969_vm2, %v1639_v11, %v1660_v8 }
 0x1b8   : >> { %v2908_v27 = vpop.xlane.xlu1 %911  ;;  %v1567_v47 = vsel %vm977_vm6, %v1557_v30, %v1566_v43  ;;  %v1662_v23 = vsel %vm971_vm3, %v1643_v42, %v1661_v60 }
 0x1b9   : >> { %v869_v28 = vpop.xlane.xlu0 %868  ;;  %v1692_v18 = vrot.slane %v2908_v27, %v1679_v10 }
 0x1ba   : >> { %v1647_v62 = vrot.slane %v869_v28, %v1630_v40 }
 0x1bc   : >> { %v829_v36 = vpop.xlane.xlu1 %828  ;;  %v1663_v25 = vsel %vm973_vm4, %v1647_v62, %v1662_v23 }
 0x1bd   : >> { %v786_v39 = vpop.xlane.xlu0 %785  ;;  %v1606_v45 = vrot.slane %v829_v36, %v1581_v32 }
 0x1be   : >> { %v1561_v46 = vrot.slane %v786_v39, %v2856_v22  ;;  %v1594_v22 = vrot.slane %v2877_v41, %v1581_v32  ;;  %v1684_v41 = vrot.slane %v2885_v56, %v1679_v10 }
 0x1c0   : >> { %v1568_v53 = vsel %vm979_vm7, %v1561_v46, %v1567_v47  ;;  %v915_v58 = vpop.xlane.xlu1 %914  ;;  %v1613_v44 = vsel %vm971_vm3, %v1594_v22, %v1612_v33  ;;  %v1709_v50 = vsel %vm967_vm1, %v1684_v41, %v1680_v16  ;;  %vm1742_vm1 = vcmask 916480  }
 0x1c1   : >> { %v1739_v55 = vsel %vm1738_vm9, %v1737_v20, %v1568_v53  ;;  %v872_v51 = vpop.xlane.xlu0 %871  ;;  %v1614_v56 = vsel %vm973_vm4, %v1598_v37, %v1613_v44  ;;  %v1696_v21 = vrot.slane %v915_v58, %v1679_v10  ;;  %v1710_v27 = vsel %vm969_vm2, %v1688_v52, %v1709_v50 }
 0x1c2   : >> { %v1651_v17 = vrot.slane %v872_v51, %v1630_v40  ;;  %v1615_v59 = vsel %vm975_vm5, %v1602_v15, %v1614_v56  ;;  %v1711_v14 = vsel %vm971_vm3, %v1692_v18, %v1710_v27  ;;  %vm1744_vm2 = vcmask 982016  }
 0x1c3   : >> { %v1616_v28 = vsel %vm977_vm6, %v1606_v45, %v1615_v59  ;;  %v1712_v36 = vsel %vm973_vm4, %v1696_v21, %v1711_v14 }
 0x1c4   : >> { %v875_v38 = vpop.xlane.xlu1 %874  ;;  %v1664_v29 = vsel %vm975_vm5, %v1651_v17, %v1663_v25 }
 0x1c5   : >> { %v832_v57 = vpop.xlane.xlu0 %831  ;;  %v1655_v19 = vrot.slane %v875_v38, %v1630_v40 }
 0x1c6   : >> { %v1610_v12 = vrot.slane %v832_v57, %v1581_v32 }
 0x1c7   : >> { %v1665_v30 = vsel %vm977_vm6, %v1655_v19, %v1664_v29 }
 0x1c8   : >> { %v878_v20 = vpop.xlane.xlu1 %877  ;;  %v1617_v31 = vsel %vm979_vm7, %v1610_v12, %v1616_v28 }
 0x1c9   : >> { %v918_v13 = vpop.xlane.xlu0 %917  ;;  %v1659_v24 = vrot.slane %v878_v20, %v1630_v40  ;;  %v1741_v47 = vsel %vm1740_vm10, %v1739_v55, %v1617_v31 }
 0x1ca   : >> { %v1700_v26 = vrot.slane %v918_v13, %v1679_v10 }
 0x1cb   : >> { %v1666_v39 = vsel %vm979_vm7, %v1659_v24, %v1665_v30 }
 0x1cc   : >> { %v924_v34 = vpop.xlane.xlu1 %923  ;;  %v1713_v46 = vsel %vm975_vm5, %v1700_v26, %v1712_v36  ;;  %v1743_v53 = vsel %vm1742_vm1, %v1741_v47, %v1666_v39 }
 0x1cd   : >> { %v921_v32 = vpop.xlane.xlu0 %920  ;;  %v1708_v43 = vrot.slane %v924_v34, %v1679_v10  ;;  %186 = sbr.rel (!%p184_p7) target bundleno = 53 (0x35), region = 90 }
 0x1ce   : >> { %v1704_v40 = vrot.slane %v921_v32, %v1679_v10 }
 0x1d0   : >> { %v1714_v48 = vsel %vm977_vm6, %v1704_v40, %v1713_v46 }
 0x1d1   : >> { %v1715_v35 = vsel %vm979_vm7, %v1708_v43, %v1714_v48 }
 0x1d2   : >> { %v1745_v54 = vsel %vm1744_vm2, %v1743_v53, %v1715_v35 }
 0x1d3   : >> { %1748 = vst [vmem:[%s1747_s15] sm:$0xff] %v1745_v54 }
 0x1d4   : > { %2012 = shalt.err (!%p2009_p0)
}
 0x1d5   : > { %s2013_s9 = scalar_lea.hbm %s2969_s17, 768  ;;  %s2017_s22 = scalar_lea.hbm %s3019_s4, 1536 }
 0x1d6   : > { %p2014_p3 = scmp.ne.s32.totalorder %s2969_s17, %s2013_s9  ;;  %p2018_p6 = scmp.lt.u32.totalorder %s2969_s17, %s3019_s4 }
 0x1d7   : > { %p2019_p7 = scmp.lt.u32.totalorder %s2017_s22, %s2013_s9  ;;  %p2021_p9 = scmp.lt.u32.totalorder %s2013_s9, %s2969_s17 }
 0x1d8   : > { %p2015_p4 = pnand %p2014_p3, %p2147_p1 }
 0x1d9   : > { %p2020_p8 = por %p2019_p7, %p2018_p6 }
 0x1da   : > { %p2016_p5 = pneg %p2015_p4 }
 0x1db   : > { %p2022_p10 = por %p2021_p9, %p2020_p8 }
 0x1dd   : > { %p2023_p11 = pnand %p2022_p10, %p2016_p5 }
 0x1df   : > { %2026 = shalt.err (!%p2023_p11)
}
 0x1e0   : > { %s2076_s11 = smov 128   ;;  %s2077_s12 = smov 8  }
 0x1e1   : > { %1924 = dma.vmem_to_hbm [thread:$0]  (%p2147_p1), %s2971_s13, 768, %s2969_s17, %s2975_s21, %s2076_s11, %s2076_s11, %s2077_s12  }
 0x1e2 PF: > { %p1930_p12 = scmp.ge.s32.totalorder %s2067_s26, 2  ;;  %s1778_s30 = sand.u32 1, %s2055_s1  }
 0x1e3   : > { %s1779_s15 = scalar_lea.sflag [#allocation6], %s1778_s30 }
 0x1e4   : > { %p1927_p13 = pnand %p1930_p12, %p2151_p2 }
 0x1e6   : > { %2050 = dma.done.wait (!%p1927_p13), %s1779_s15, 768  }
 0x1e7   : > { %2052 = vsyncadd (!%p1927_p13), %s1779_s15, 4294966528  ;;  %p24_p0 = scmp.ge.s32.totalorder %s2134_s29, 4   ;;  %s3023_s1 = smov %s2059_s24 }
 0x1e8   : > { %s3024_s24 = smov %s2063_s25  ;;  %s3025_s25 = smov %s2145_s6 }
 0x1e9   : > { %s3026_s26 = smov %s2134_s29  ;;  %26 = sbr.rel (!%p24_p0) target bundleno = 28 (0x1c), region = 101 }
 0x1f0   :  { %1784 = vsyncpa [#allocation6], 1 }
 0x1f1   :  { %1786 = vsyncpa [#allocation6 + $0x1], 1 }

</bundles_post_ra>
